<compile_context>
chip_gen: v7x
topology: tpu7x:2x2x1
jax: 0.10.0
libtpu: 0.0.40
codegen_flags: <defaults>
</compile_context>

<pallas_src>
import functools

import jax
import jax.numpy as jnp
from jax.experimental import pallas as pl
from jax.experimental.pallas import tpu as pltpu

LANE = 128
MIB = 1024 * 1024


def _round_up(x, m):
    return ((x + m - 1) // m) * m


def _vmem_capacity_bytes():
    """Total physical VMEM (64 MiB v7x, 128 MiB v5e/v6e); conservative default."""
    try:
        info = pltpu.get_tpu_info()
        cap = getattr(info, "vmem_capacity_bytes", None)
        if cap:
            return int(cap)
    except Exception:
        pass
    return 64 * MIB


def _plan_tiles(B, S, Dd, De2, itemsize, max_tb=None, max_ts=None):
    """Layout-aware tile planning. Returns (TB, B_pad, TS, S_pad, vmem_limit)."""
    sub = 8 if itemsize >= 4 else 16              # sublane multiple for matmul dtype
    Dd_pad = _round_up(Dd, LANE)
    De2_pad = _round_up(De2, LANE)
    S128 = _round_up(S, LANE)

    cap = _vmem_capacity_bytes()
    total_budget = int(0.75 * cap)                # ~48 MiB v7x, ~96 MiB v5e/v6e
    enc_buf_cap = 8 * MIB if total_budget >= 64 * MIB else 6 * MIB
    slack = 2 * MIB

    # Resident weights (layout-padded VMEM footprint).
    weights = (Dd_pad * Dd_pad * itemsize          # Wh  (matmul dtype)
               + De2_pad * Dd_pad * itemsize       # We  (matmul dtype)
               + 8 * Dd_pad * 4                    # bias (1, Dd) f32
               + Dd_pad * LANE * itemsize)         # v   (Dd, 1)

    def need_bytes(tb, ts, s_pad):
        enc_buf = ts * tb * De2_pad * itemsize                      # one pipeline buffer
        inter = ts * tb * (2 * Dd_pad * 4 + Dd_pad * itemsize + LANE * 4)
        fixed = weights + tb * Dd_pad * 4 + 2 * tb * s_pad * 4
        return fixed + 2 * enc_buf + inter + slack, enc_buf

    # Batch tile: whole padded batch; split ~in half (v7x megacore) only when
    # the batch is big enough and each strided DMA run stays >= 4 KiB.
    tb = _round_up(B, sub)
    half = (tb // 2 // sub) * sub
    if half >= sub and half < tb and half * De2 * itemsize >= 4096:
        tb = half
    if max_tb is not None:                        # test/debug hook
        tb = min(tb, max(sub, (max_tb // sub) * sub))

    cand_list = [S128] + [t for t in (8192, 4096, 2048, 1024, 512, 256, 128)
                          if t < S128]
    if max_ts is not None:                        # test/debug hook
        cand_list = [t for t in cand_list if t <= max(LANE, max_ts)] or [LANE]

    ts, s_pad = LANE, _round_up(S, LANE)
    while True:
        chosen = None
        for cand in cand_list:
            sp = _round_up(S, cand)
            need, enc_buf = need_bytes(tb, cand, sp)
            if enc_buf <= enc_buf_cap and need <= total_budget:
                chosen = (cand, sp)
                break
        if chosen is not None:
            ts, s_pad = chosen
            break
        if tb <= sub:
            ts, s_pad = LANE, _round_up(S, LANE)  # last resort: smallest tiles
            break
        tb = max(sub, (tb // 2 // sub) * sub)     # shrink TB, never overshoot VMEM

    b_pad = _round_up(B, tb)
    need, _ = need_bytes(tb, ts, s_pad)
    vmem_limit = int(min(max(total_budget, int(1.25 * need)), int(0.9 * cap)))
    return tb, b_pad, ts, s_pad, vmem_limit


def _attention_kernel(hid_ref, enc_ref, wh_ref, we_ref, b_ref, v_ref,
                      out_ref, ehb_ref, *, S, TS, TB, flat):
    si = pl.program_id(1)
    n_s = pl.num_programs(1)
    dd = ehb_ref.shape[1]

    # Hidden projection + bias: once per batch tile, kept VMEM-resident.
    @pl.when(si == 0)
    def _():
        ehb_ref[...] = (jnp.dot(hid_ref[...], wh_ref[...],
                                preferred_element_type=jnp.float32)
                        + b_ref[...])

    if flat:
        enc2d = enc_ref[...]                                    # (TS*TB, De2) contiguous
    else:
        enc = enc_ref[...]                                      # (TS, TB, De2)
        enc2d = enc.reshape(TS * TB, enc.shape[-1])

    # Encoder projection on the MXU (matmul-dtype operands, f32 accumulation).
    e_enc = jnp.dot(enc2d, we_ref[...],
                    preferred_element_type=jnp.float32)         # (TS*TB, Dd)
    energy = jnp.tanh(e_enc.reshape(TS, TB, dd)
                      + ehb_ref[...][None, :, :])               # (TS, TB, Dd) f32

    # v-projection on the MXU in the matmul dtype (f32 accumulation).
    energy2d = energy.reshape(TS * TB, dd).astype(v_ref.dtype)
    scores = jnp.dot(energy2d, v_ref[...],
                     preferred_element_type=jnp.float32)        # (TS*TB, 1)
    scores_bs = scores.reshape(TS, TB).T                        # tiny (TS,TB)->(TB,TS)

    # Stash raw scores into the resident, lane-dense (TB, S_pad) output block.
    col = pl.multiple_of(si * TS, TS)
    out_ref[:, pl.ds(col, TS)] = scores_bs

    # Last sequence tile: masked softmax (exact divide) over the full row.
    @pl.when(si == n_s - 1)
    def _():
        att = out_ref[...]                                      # (TB, S_pad)
        lane = jax.lax.broadcasted_iota(jnp.int32, att.shape, 1)
        att = jnp.where(lane < S, att, -jnp.inf)                # mask S padding
        m = jnp.max(att, axis=-1, keepdims=True)
        ex = jnp.exp(att - m)
        out_ref[...] = ex / jnp.sum(ex, axis=-1, keepdims=True)


def attention_forward(hidden, encoder_outputs, attn_w, attn_b, v_w,
                      *, matmul_dtype=jnp.bfloat16, max_tb=None, max_ts=None):
    """hidden: (B, Dd); encoder_outputs: (S, B, 2*De)  -> (B, S) float32."""
    B, Dd = hidden.shape
    S, B2, De2 = encoder_outputs.shape
    assert B2 == B
    itemsize = jnp.dtype(matmul_dtype).itemsize

    TB, B_pad, TS, S_pad, vmem_limit = _plan_tiles(
        B, S, Dd, De2, itemsize, max_tb=max_tb, max_ts=max_ts)
    grid = (B_pad // TB, S_pad // TS)
    flat = (TB == B_pad)            # single batch tile -> fully contiguous encoder DMA

    # ---- operand preparation (keep (S, B, De2) layout; pad B and S) --------
    enc = encoder_outputs.astype(matmul_dtype)
    enc = jnp.pad(enc, ((0, S_pad - S), (0, B_pad - B), (0, 0)))
    hid = jnp.pad(hidden, ((0, B_pad - B), (0, 0))).astype(matmul_dtype)

    # Concat order in the PyTorch forward is [hidden, encoder]:
    wh = attn_w[:, :Dd].T.astype(matmul_dtype)        # (Dd, Dd)  -> hidden (once/tile)
    we = attn_w[:, Dd:].T.astype(matmul_dtype)        # (De2, Dd) -> encoder stream
    b = attn_b.reshape(1, Dd).astype(jnp.float32)     # (1, Dd), folded once in f32
    v = v_w.reshape(Dd, 1).astype(matmul_dtype)       # (Dd, 1)

    if flat:
        enc = enc.reshape(S_pad * B_pad, De2)         # metadata-only reshape
        enc_spec = pl.BlockSpec((TS * TB, De2), lambda bi, si: (si, 0))
    else:
        enc_spec = pl.BlockSpec((TS, TB, De2), lambda bi, si: (si, bi, 0))

    kernel = functools.partial(_attention_kernel, S=S, TS=TS, TB=TB, flat=flat)

    out = pl.pallas_call(
        kernel,
        out_shape=jax.ShapeDtypeStruct((B_pad, S_pad), jnp.float32),
        grid=grid,
        in_specs=[
            pl.BlockSpec((TB, Dd), lambda bi, si: (bi, 0)),    # hidden
            enc_spec,                                          # encoder stream
            pl.BlockSpec((Dd, Dd), lambda bi, si: (0, 0)),     # Wh  (resident)
            pl.BlockSpec((De2, Dd), lambda bi, si: (0, 0)),    # We  (resident)
            pl.BlockSpec((1, Dd), lambda bi, si: (0, 0)),      # bias (resident)
            pl.BlockSpec((Dd, 1), lambda bi, si: (0, 0)),      # v   (resident)
        ],
        out_specs=pl.BlockSpec((TB, S_pad), lambda bi, si: (bi, 0)),
        scratch_shapes=[pltpu.VMEM((TB, Dd), jnp.float32)],    # hidden-proj + bias
        compiler_params=pltpu.CompilerParams(
            dimension_semantics=("parallel", "arbitrary"),
            vmem_limit_bytes=vmem_limit),
    )(hid, enc, wh, we, b, v)

    return out[:B, :S]


def _reference(hidden, encoder_outputs, attn_w, attn_b, v_w):
    """Pure-JAX replica of the PyTorch forward, for verification."""
    S = encoder_outputs.shape[0]
    h_rep = jnp.repeat(hidden[:, None, :], S, axis=1)                 # (B, S, Dd)
    enc = jnp.transpose(encoder_outputs, (1, 0, 2))                   # (B, S, De2)
    cat = jnp.concatenate([h_rep, enc], axis=2)                       # (B, S, Dd+De2)
    energy = jnp.tanh(jnp.einsum('bsc,hc->bsh', cat, attn_w,
                                 precision=jax.lax.Precision.HIGHEST) + attn_b)
    att = jnp.einsum('bsh,oh->bso', energy, v_w,
                     precision=jax.lax.Precision.HIGHEST)[..., 0]     # (B, S)
    return jax.nn.softmax(att, axis=1)


if __name__ == "__main__":
    enc_hid_dim = 16         # -> encoder feature dim = 2 * 16 = 32
    dec_hid_dim = 32
    cat_dim = enc_hid_dim * 2 + dec_hid_dim

    key = jax.random.PRNGKey(0)
    k1, k2, k3, k4, k5, k6, k7 = jax.random.split(key, 7)

    # Deterministic synthetic parameters (uniform, PyTorch-Linear-like scale)
    lim_attn = 1.0 / jnp.sqrt(cat_dim)
    lim_v = 1.0 / jnp.sqrt(dec_hid_dim)
    attn_w = jax.random.uniform(k1, (dec_hid_dim, cat_dim),
                                minval=-lim_attn, maxval=lim_attn, dtype=jnp.float32)
    attn_b = jax.random.uniform(k2, (dec_hid_dim,),
                                minval=-lim_attn, maxval=lim_attn, dtype=jnp.float32)
    v_w = jax.random.uniform(k3, (1, dec_hid_dim),
                             minval=-lim_v, maxval=lim_v, dtype=jnp.float32)

    # ---- Case 1: module-scale shapes (batch=2, src_len=8) ------------------
    batch, src_len = 2, 8
    hidden = jax.random.normal(k4, (batch, dec_hid_dim), dtype=jnp.float32)
    encoder_outputs = jax.random.normal(
        k5, (src_len, batch, enc_hid_dim * 2), dtype=jnp.float32)
    ref = _reference(hidden, encoder_outputs, attn_w, attn_b, v_w)

    # Exact path (f32 operands) -> tight check against reference.
    out_f32 = jax.block_until_ready(
        attention_forward(hidden, encoder_outputs, attn_w, attn_b, v_w,
                          matmul_dtype=jnp.float32))
    assert out_f32.shape == (batch, src_len)
    assert jnp.allclose(out_f32, ref, atol=1e-5, rtol=1e-5)

    # Fast path (bf16 matmul operands) -> loose check.
    out_bf16 = jax.block_until_ready(
        attention_forward(hidden, encoder_outputs, attn_w, attn_b, v_w,
                          matmul_dtype=jnp.bfloat16))
    assert out_bf16.shape == (batch, src_len)
    assert jnp.allclose(out_bf16, ref, atol=3e-2, rtol=3e-2)
    assert jnp.allclose(out_bf16.sum(axis=1), 1.0, atol=1e-4)

    # ---- Case 2: padded batch + multi-sequence-tile path (forced small tiles)
    batch2, src_len2 = 12, 200
    hidden2 = jax.random.normal(k6, (batch2, dec_hid_dim), dtype=jnp.float32)
    enc2 = jax.random.normal(k7, (src_len2, batch2, enc_hid_dim * 2),
                             dtype=jnp.float32)
    ref2 = _reference(hidden2, enc2, attn_w, attn_b, v_w)
    out2 = jax.block_until_ready(
        attention_forward(hidden2, enc2, attn_w, attn_b, v_w,
                          matmul_dtype=jnp.float32, max_ts=128, max_tb=8))
    assert out2.shape == (batch2, src_len2)
    assert jnp.allclose(out2, ref2, atol=1e-4, rtol=1e-4)

    print("KERNEL_OK")
</pallas_src>

<mosaic_0001>
module attributes {stable_mosaic.version = 11 : i64} {
  func.func @_attention_kernel(%arg0: i32, %arg1: i32, %arg2: memref<8x32xf32, #tpu.memory_space<vmem>>, %arg3: memref<1024x32xf32, #tpu.memory_space<vmem>>, %arg4: memref<32x32xf32, #tpu.memory_space<vmem>>, %arg5: memref<32x32xf32, #tpu.memory_space<vmem>>, %arg6: memref<1x32xf32, #tpu.memory_space<vmem>>, %arg7: memref<32x1xf32, #tpu.memory_space<vmem>>, %arg8: memref<8x128xf32, #tpu.memory_space<vmem>>, %arg9: memref<8x32xf32, #tpu.memory_space<vmem>>) attributes {dimension_semantics = [#tpu.dimension_semantics<parallel>, #tpu.dimension_semantics<arbitrary>], iteration_bounds = array<i64: 1, 1>, scalar_prefetch = 0 : i64, scratch_operands = 1 : i64, tpu.core_type = #tpu.core_type<tc>, window_params = [{transform_indices = @transform_0, window_bounds = array<i64: 8, 32>}, {transform_indices = @transform_1, window_bounds = array<i64: 1024, 32>}, {pipeline_mode = #tpu.pipeline_mode<synchronous>, transform_indices = @transform_2, window_bounds = array<i64: 32, 32>}, {pipeline_mode = #tpu.pipeline_mode<synchronous>, transform_indices = @transform_3, window_bounds = array<i64: 32, 32>}, {pipeline_mode = #tpu.pipeline_mode<synchronous>, transform_indices = @transform_4, window_bounds = array<i64: 1, 32>}, {pipeline_mode = #tpu.pipeline_mode<synchronous>, transform_indices = @transform_5, window_bounds = array<i64: 32, 1>}, {transform_indices = @transform_6, window_bounds = array<i64: 8, 128>}]} {
    %c0_i32 = arith.constant 0 : i32
    %0 = arith.cmpi eq, %arg1, %c0_i32 : i32
    %1 = arith.extui %0 : i1 to i32
    %c0_i32_0 = arith.constant 0 : i32
    %2 = arith.cmpi ne, %1, %c0_i32_0 : i32
    scf.if %2 {
      %c0_12 = arith.constant 0 : index
      %c0_13 = arith.constant 0 : index
      %24 = vector.load %arg2[%c0_12, %c0_13] : memref<8x32xf32, #tpu.memory_space<vmem>>, vector<8x32xf32>
      %c0_14 = arith.constant 0 : index
      %c0_15 = arith.constant 0 : index
      %25 = vector.load %arg4[%c0_14, %c0_15] : memref<32x32xf32, #tpu.memory_space<vmem>>, vector<32x32xf32>
      %cst_16 = arith.constant dense<0.000000e+00> : vector<8x32xf32>
      %26 = tpu.matmul %24, %25, %cst_16 {dimension_numbers = #tpu.dot_dimension_numbers<[1], [0], [0], [1], [0, 0, 1, 1], [], []>} : vector<8x32xf32>, vector<32x32xf32>, vector<8x32xf32> -> vector<8x32xf32>
      %c0_17 = arith.constant 0 : index
      %c0_18 = arith.constant 0 : index
      %27 = vector.load %arg6[%c0_17, %c0_18] : memref<1x32xf32, #tpu.memory_space<vmem>>, vector<1x32xf32>
      %28 = vector.broadcast %27 : vector<1x32xf32> to vector<8x32xf32>
      %29 = arith.addf %26, %28 : vector<8x32xf32>
      %c0_19 = arith.constant 0 : index
      %c0_20 = arith.constant 0 : index
      %30 = vector.load %arg9[%c0_19, %c0_20] : memref<8x32xf32, #tpu.memory_space<vmem>>, vector<8x32xf32>
      tpu.vector_store %arg9[%c0_19, %c0_20], %29 {strides = array<i32>} : memref<8x32xf32, #tpu.memory_space<vmem>>, vector<8x32xf32>,
    } else {
    }
    %c0 = arith.constant 0 : index
    %c0_1 = arith.constant 0 : index
    %3 = vector.load %arg3[%c0, %c0_1] : memref<1024x32xf32, #tpu.memory_space<vmem>>, vector<1024x32xf32>
    %c0_2 = arith.constant 0 : index
    %c0_3 = arith.constant 0 : index
    %4 = vector.load %arg5[%c0_2, %c0_3] : memref<32x32xf32, #tpu.memory_space<vmem>>, vector<32x32xf32>
    %cst = arith.constant dense<0.000000e+00> : vector<1024x32xf32>
    %5 = tpu.matmul %3, %4, %cst {dimension_numbers = #tpu.dot_dimension_numbers<[1], [0], [0], [1], [0, 0, 1, 1], [], []>} : vector<1024x32xf32>, vector<32x32xf32>, vector<1024x32xf32> -> vector<1024x32xf32>
    %6 = vector.shape_cast %5 : vector<1024x32xf32> to vector<128x8x32xf32>
    %c0_4 = arith.constant 0 : index
    %c0_5 = arith.constant 0 : index
    %7 = vector.load %arg9[%c0_4, %c0_5] : memref<8x32xf32, #tpu.memory_space<vmem>>, vector<8x32xf32>
    %8 = vector.shape_cast %7 : vector<8x32xf32> to vector<1x8x32xf32>
    %9 = vector.broadcast %8 : vector<1x8x32xf32> to vector<128x8x32xf32>
    %10 = arith.addf %6, %9 : vector<128x8x32xf32>
    %11 = math.tanh %10 : vector<128x8x32xf32>
    %12 = vector.shape_cast %11 : vector<128x8x32xf32> to vector<1024x32xf32>
    %c0_6 = arith.constant 0 : index
    %c0_7 = arith.constant 0 : index
    %13 = vector.load %arg7[%c0_6, %c0_7] : memref<32x1xf32, #tpu.memory_space<vmem>>, vector<32x1xf32>
    %cst_8 = arith.constant dense<0.000000e+00> : vector<1024x1xf32>
    %14 = tpu.matmul %12, %13, %cst_8 {dimension_numbers = #tpu.dot_dimension_numbers<[1], [0], [0], [1], [0, 0, 1, 1], [], []>} : vector<1024x32xf32>, vector<32x1xf32>, vector<1024x1xf32> -> vector<1024x1xf32>
    %15 = vector.shape_cast %14 : vector<1024x1xf32> to vector<128x8xf32>
    %16 = tpu.transpose %15, [1, 0] : vector<128x8xf32> -> vector<8x128xf32>
    %c128_i32 = arith.constant 128 : i32
    %17 = arith.muli %arg1, %c128_i32 : i32
    %18 = tpu.assume_multiple %17, 128 : i32
    %c0_9 = arith.constant 0 : index
    %19 = arith.index_cast %18 : i32 to index
    %20 = vector.load %arg8[%c0_9, %19] : memref<8x128xf32, #tpu.memory_space<vmem>>, vector<8x128xf32>
    tpu.vector_store %arg8[%c0_9, %19], %16 {strides = array<i32>} : memref<8x128xf32, #tpu.memory_space<vmem>>, vector<8x128xf32>,
    %c0_i32_10 = arith.constant 0 : i32
    %21 = arith.cmpi eq, %arg1, %c0_i32_10 : i32
    %22 = arith.extui %21 : i1 to i32
    %c0_i32_11 = arith.constant 0 : i32
    %23 = arith.cmpi ne, %22, %c0_i32_11 : i32
    scf.if %23 {
      %c0_12 = arith.constant 0 : index
      %c0_13 = arith.constant 0 : index
      %24 = vector.load %arg8[%c0_12, %c0_13] : memref<8x128xf32, #tpu.memory_space<vmem>>, vector<8x128xf32>
      %25 = tpu.iota {dimensions = array<i32: 1>} : vector<8x128xi32>
      %c8_i32 = arith.constant 8 : i32
      %26 = vector.broadcast %c8_i32 : i32 to vector<8x128xi32>
      %27 = arith.cmpi slt, %25, %26 : vector<8x128xi32>
      %cst_14 = arith.constant 0xFF800000 : f32
      %28 = vector.broadcast %cst_14 : f32 to vector<8x128xf32>
      %29 = arith.select %27, %24, %28 : vector<8x128xi1>, vector<8x128xf32>
      %cst_15 = arith.constant dense<0xFF800000> : vector<8xf32>
      %30 = vector.multi_reduction <maximumf>, %29, %cst_15 [1] : vector<8x128xf32> to vector<8xf32>
      %31 = vector.shape_cast %30 : vector<8xf32> to vector<8x1xf32>
      %32 = vector.broadcast %31 : vector<8x1xf32> to vector<8x128xf32>
      %33 = arith.subf %29, %32 : vector<8x128xf32>
      %34 = math.exp %33 : vector<8x128xf32>
      %cst_16 = arith.constant dense<0.000000e+00> : vector<8xf32>
      %35 = vector.multi_reduction <add>, %34, %cst_16 [1] : vector<8x128xf32> to vector<8xf32>
      %36 = vector.shape_cast %35 : vector<8xf32> to vector<8x1xf32>
      %37 = vector.broadcast %36 : vector<8x1xf32> to vector<8x128xf32>
      %38 = arith.divf %34, %37 : vector<8x128xf32>
      %c0_17 = arith.constant 0 : index
      %c0_18 = arith.constant 0 : index
      %39 = vector.load %arg8[%c0_17, %c0_18] : memref<8x128xf32, #tpu.memory_space<vmem>>, vector<8x128xf32>
      tpu.vector_store %arg8[%c0_17, %c0_18], %38 {strides = array<i32>} : memref<8x128xf32, #tpu.memory_space<vmem>>, vector<8x128xf32>,
    } else {
    }
    return
  }
  func.func @transform_0(%arg0: i32, %arg1: i32) -> (i32, i32) {
    %c0_i32 = arith.constant 0 : i32
    %c0_i32_0 = arith.constant 0 : i32
    return %arg0, %c0_i32 : i32, i32
  }
  func.func @transform_1(%arg0: i32, %arg1: i32) -> (i32, i32) {
    %c0_i32 = arith.constant 0 : i32
    %c0_i32_0 = arith.constant 0 : i32
    return %arg1, %c0_i32 : i32, i32
  }
  func.func @transform_2(%arg0: i32, %arg1: i32) -> (i32, i32) {
    %c0_i32 = arith.constant 0 : i32
    %c0_i32_0 = arith.constant 0 : i32
    %c0_i32_1 = arith.constant 0 : i32
    return %c0_i32, %c0_i32_0 : i32, i32
  }
  func.func @transform_3(%arg0: i32, %arg1: i32) -> (i32, i32) {
    %c0_i32 = arith.constant 0 : i32
    %c0_i32_0 = arith.constant 0 : i32
    %c0_i32_1 = arith.constant 0 : i32
    return %c0_i32, %c0_i32_0 : i32, i32
  }
  func.func @transform_4(%arg0: i32, %arg1: i32) -> (i32, i32) {
    %c0_i32 = arith.constant 0 : i32
    %c0_i32_0 = arith.constant 0 : i32
    %c0_i32_1 = arith.constant 0 : i32
    return %c0_i32, %c0_i32_0 : i32, i32
  }
  func.func @transform_5(%arg0: i32, %arg1: i32) -> (i32, i32) {
    %c0_i32 = arith.constant 0 : i32
    %c0_i32_0 = arith.constant 0 : i32
    %c0_i32_1 = arith.constant 0 : i32
    return %c0_i32, %c0_i32_0 : i32, i32
  }
  func.func @transform_6(%arg0: i32, %arg1: i32) -> (i32, i32) {
    %c0_i32 = arith.constant 0 : i32
    %c0_i32_0 = arith.constant 0 : i32
    return %arg0, %c0_i32 : i32, i32
  }
}

</mosaic_0001>

<bundles_post_ra>
// kernel: tpu_custom_call.1
= control target key start
LH: loop header
LB: loop body
LE: loop exit
PB: predicated region body
PF: predicated region fallthrough
CT: control target
= control target key end

     0   :  { %v5172_v3 = vmov 0.0|0.0   ;;  %vm5173_vm0 = vmmov 0   ;;  %v5174_v8 = vmov 0.0   ;;  %vm40_vm1 = vcmask 261120   ;;  %s6472_s0 = inlined_call_operand.vmem [shape: f32[8,32], index: 0, kind: input, shape index: {}]   ;;  %s6473_s1 = inlined_call_operand.vmem [shape: f32[1024,32], index: 1, kind: input, shape index: {}]   ;;  %s6474_s2 = inlined_call_operand.vmem [shape: f32[32,32], index: 2, kind: input, shape index: {}]   ;;  %s6475_s3 = inlined_call_operand.vmem [shape: f32[32,32], index: 3, kind: input, shape index: {}]   ;;  %s6476_s4 = inlined_call_operand.vmem [shape: f32[1,32], index: 4, kind: input, shape index: {}]   ;;  %s6477_s5 = inlined_call_operand.vmem [shape: f32[32,1], index: 5, kind: input, shape index: {}]   ;;  %s6478_s6 = inlined_call_operand.hbm [shape: f32[8,128], index: 6, kind: output, shape index: {}]  }
   0x1   :  { %v29_v0 = vld [vmem:[%s6474_s2] sm:$0xff]  ;;  %v30_v1 = vld [vmem:[%s6474_s2 + $0x8] sm:$0xff]  ;;  %4854 = vmatprep.subr.bf16.mxu0 %v5172_v3  ;;  %v31_v6 = vld [vmem:[%s6474_s2 + $0x10] sm:$0xff]  ;;  %4451 = vmatprep.mubr.msk.f32.mxu0 %vm5173_vm0, %v5174_v8 }
   0x2   :  { %v243_v2 = vld [vmem:[%s6475_s3] sm:$0xff]  ;;  %v4855_v4 = vpack.c.bf16 %v30_v1, %v29_v0  ;;  %v244_v5 = vld [vmem:[%s6475_s3 + $0x8] sm:$0xff]  ;;  %v32_v7 = vld [vmem:[%s6474_s2 + $0x18] sm:$0xff] }
   0x3   :  { %v4860_v9 = vpack.c.bf16 %v244_v5, %v243_v2  ;;  %v245_v10 = vld [vmem:[%s6475_s3 + $0x10] sm:$0xff]  ;;  %v246_v11 = vld [vmem:[%s6475_s3 + $0x18] sm:$0xff]  ;;  %v4858_v12 = vpack.c.bf16 %v32_v7, %v31_v6  ;;  %v115_v14 = vld [vmem:[%s6473_s1] sm:$0xff] }
   0x4   :  { %4856 = vmatpush3.bf16.msra.mxu0 %v4855_v4  ;;  %v4864_v13 = vpack.c.bf16 %v246_v11, %v245_v10  ;;  %4462 = vmatprep.mubr.msk.f32.mxu1 %vm40_vm1, %v115_v14  ;;  %v28_v15 = vld [vmem:[%s6472_s0] sm:$0xff]  ;;  %v116_v16 = vld [vmem:[%s6473_s1 + $0x8] sm:$0xff]  ;;  %v117_v17 = vld [vmem:[%s6473_s1 + $0x10] sm:$0xff] }
   0x5   :  { %4861 = vmatprep.subr.bf16.mxu1 %v4860_v9  ;;  %4857 = vmatprep.subr.bf16.mxu0 %v5172_v3  ;;  %v118_v18 = vld [vmem:[%s6473_s1 + $0x18] sm:$0xff]  ;;  %v119_v19 = vld [vmem:[%s6473_s1 + $0x20] sm:$0xff]  ;;  %v120_v20 = vld [vmem:[%s6473_s1 + $0x28] sm:$0xff] }
   0x6   :  { %4863 = vmatpush3.bf16.msra.mxu1 %v4860_v9  ;;  %v121_v21 = vld [vmem:[%s6473_s1 + $0x30] sm:$0xff]  ;;  %v122_v22 = vld [vmem:[%s6473_s1 + $0x38] sm:$0xff]  ;;  %v123_v23 = vld [vmem:[%s6473_s1 + $0x40] sm:$0xff] }
   0x7   :  { %4865 = vmatprep.subr.bf16.mxu1 %v4864_v13  ;;  %v124_v24 = vld [vmem:[%s6473_s1 + $0x48] sm:$0xff]  ;;  %v125_v25 = vld [vmem:[%s6473_s1 + $0x50] sm:$0xff] }
   0x8   :  { %4859 = vmatpush3.bf16.msra.mxu0 %v4858_v12 }
   0xa   :  { %4867 = vmatpush3.bf16.msra.mxu1 %v4864_v13 }
   0xb   :  { %4452 = vmatmul.mubr.msk.f32.vlgmr.msra.gmra.mrb[0].mxu0 %vm40_vm1, %v28_v15 }
   0xd   :  { %4463 = vmatmul.mubr.msk.f32.vlgmr.msra.gmra.mrb[0].mxu1 %vm40_vm1, %v116_v16 }
   0xe   :  { %4465 = vmatprep.mubr.msk.f32.mxu1 %vm40_vm1, %v117_v17 }
  0x11   :  { %4466 = vmatmul.mubr.msk.f32.gmra.mrb[2].mxu1 %vm40_vm1, %v118_v18 }
  0x12   :  { %4468 = vmatprep.mubr.msk.f32.mxu1 %vm40_vm1, %v119_v19 }
  0x15   :  { %4469 = vmatmul.mubr.msk.f32.gmra.mrb[4].mxu1 %vm40_vm1, %v120_v20 }
  0x16   :  { %4471 = vmatprep.mubr.msk.f32.mxu1 %vm40_vm1, %v121_v21 }
  0x19   :  { %4472 = vmatmul.mubr.msk.f32.gmra.mrb[6].mxu1 %vm40_vm1, %v122_v22 }
  0x1a   :  { %4474 = vmatprep.mubr.msk.f32.mxu1 %vm40_vm1, %v123_v23 }
  0x1b   :  { %11 = vsyncpa [#allocation4], 0  ;;  %v126_v26 = vld [vmem:[%s6473_s1 + $0x58] sm:$0xff]  ;;  %v127_v27 = vld [vmem:[%s6473_s1 + $0x60] sm:$0xff]  ;;  %vm3713_vm2 = vcmask 1041409   ;;  %vm3715_vm3 = vcmask 1042434  }
  0x1c   :  { %v128_v28 = vld [vmem:[%s6473_s1 + $0x68] sm:$0xff]  ;;  %v129_v29 = vld [vmem:[%s6473_s1 + $0x70] sm:$0xff]  ;;  %v130_v30 = vld [vmem:[%s6473_s1 + $0x78] sm:$0xff]  ;;  %vm3717_vm4 = vcmask 1043459   ;;  %vm3719_vm5 = vcmask 1044484   ;;  %vm3721_vm6 = vcmask 1045509  }
  0x1d   :  { %4475 = vmatmul.mubr.msk.f32.gmra.mrb[8].mxu1 %vm40_vm1, %v124_v24  ;;  %v131_v31 = vld [vmem:[%s6473_s1 + $0x80] sm:$0xff]  ;;  %v132_v32 = vld [vmem:[%s6473_s1 + $0x88] sm:$0xff]  ;;  %v133_v33 = vld [vmem:[%s6473_s1 + $0x90] sm:$0xff]  ;;  %vm3723_vm7 = vcmask 1046534   ;;  %vm3725_vm8 = vcmask 1047559  }
  0x1e   :  { %4477 = vmatprep.mubr.msk.f32.mxu1 %vm40_vm1, %v125_v25  ;;  %v134_v34 = vld [vmem:[%s6473_s1 + $0x98] sm:$0xff]  ;;  %v135_v35 = vld [vmem:[%s6473_s1 + $0xa0] sm:$0xff]  ;;  %v136_v36 = vld [vmem:[%s6473_s1 + $0xa8] sm:$0xff] }
  0x1f   :  { %v137_v37 = vld [vmem:[%s6473_s1 + $0xb0] sm:$0xff]  ;;  %v138_v38 = vld [vmem:[%s6473_s1 + $0xb8] sm:$0xff]  ;;  %v139_v39 = vld [vmem:[%s6473_s1 + $0xc0] sm:$0xff] }
  0x20   :  { %v140_v40 = vld [vmem:[%s6473_s1 + $0xc8] sm:$0xff]  ;;  %v141_v41 = vld [vmem:[%s6473_s1 + $0xd0] sm:$0xff]  ;;  %v142_v42 = vld [vmem:[%s6473_s1 + $0xd8] sm:$0xff] }
  0x21   :  { %4478 = vmatmul.mubr.msk.f32.gmra.mrb[10].mxu1 %vm40_vm1, %v126_v26  ;;  %v143_v43 = vld [vmem:[%s6473_s1 + $0xe0] sm:$0xff]  ;;  %v144_v44 = vld [vmem:[%s6473_s1 + $0xe8] sm:$0xff]  ;;  %v145_v45 = vld [vmem:[%s6473_s1 + $0xf0] sm:$0xff] }
  0x22   :  { %4480 = vmatprep.mubr.msk.f32.mxu1 %vm40_vm1, %v127_v27  ;;  %v146_v46 = vld [vmem:[%s6473_s1 + $0xf8] sm:$0xff]  ;;  %v147_v47 = vld [vmem:[%s6473_s1 + $0x100] sm:$0xff]  ;;  %v148_v48 = vld [vmem:[%s6473_s1 + $0x108] sm:$0xff] }
  0x23   :  { %v149_v49 = vld [vmem:[%s6473_s1 + $0x110] sm:$0xff]  ;;  %v150_v50 = vld [vmem:[%s6473_s1 + $0x118] sm:$0xff]  ;;  %v151_v51 = vld [vmem:[%s6473_s1 + $0x120] sm:$0xff] }
  0x24   :  { %v152_v52 = vld [vmem:[%s6473_s1 + $0x128] sm:$0xff]  ;;  %v153_v53 = vld [vmem:[%s6473_s1 + $0x130] sm:$0xff]  ;;  %v154_v54 = vld [vmem:[%s6473_s1 + $0x138] sm:$0xff] }
  0x25   :  { %4481 = vmatmul.mubr.msk.f32.gmra.mrb[12].mxu1 %vm40_vm1, %v128_v28  ;;  %v155_v55 = vld [vmem:[%s6473_s1 + $0x140] sm:$0xff]  ;;  %v156_v56 = vld [vmem:[%s6473_s1 + $0x148] sm:$0xff]  ;;  %v157_v57 = vld [vmem:[%s6473_s1 + $0x150] sm:$0xff] }
  0x26   :  { %4483 = vmatprep.mubr.msk.f32.mxu1 %vm40_vm1, %v129_v29  ;;  %v158_v58 = vld [vmem:[%s6473_s1 + $0x158] sm:$0xff]  ;;  %v159_v59 = vld [vmem:[%s6473_s1 + $0x160] sm:$0xff]  ;;  %v160_v60 = vld [vmem:[%s6473_s1 + $0x168] sm:$0xff] }
  0x27   :  { %v161_v61 = vld [vmem:[%s6473_s1 + $0x170] sm:$0xff]  ;;  %v162_v62 = vld [vmem:[%s6473_s1 + $0x178] sm:$0xff]  ;;  %v163_v63 = vld [vmem:[%s6473_s1 + $0x180] sm:$0xff] }
  0x28   :  { %v164_v0 = vld [vmem:[%s6473_s1 + $0x188] sm:$0xff]  ;;  %v165_v1 = vld [vmem:[%s6473_s1 + $0x190] sm:$0xff]  ;;  %v166_v2 = vld [vmem:[%s6473_s1 + $0x198] sm:$0xff] }
  0x29   :  { %4484 = vmatmul.mubr.msk.f32.gmra.mrb[14].mxu1 %vm40_vm1, %v130_v30  ;;  %v167_v3 = vld [vmem:[%s6473_s1 + $0x1a0] sm:$0xff]  ;;  %v1595_v5 = vld [vmem:[%s6477_s5 + $0x8] sm:$0xff]  ;;  %v169_v8 = vld [vmem:[%s6473_s1 + $0x1b0] sm:$0xff] }
  0x2a   :  { %4486 = vmatprep.mubr.msk.f32.mxu1 %vm40_vm1, %v131_v31  ;;  %v1594_v4 = vld [vmem:[%s6477_s5] sm:$0xff]  ;;  %v168_v6 = vld [vmem:[%s6473_s1 + $0x1a8] sm:$0xff]  ;;  %v1596_v9 = vld [vmem:[%s6477_s5 + $0x10] sm:$0xff] }
  0x2b   :  { %v4868_v7 = vpack.c.bf16 %v1595_v5, %v1594_v4  ;;  %v1597_v10 = vld [vmem:[%s6477_s5 + $0x18] sm:$0xff]  ;;  %v171_v13 = vld [vmem:[%s6473_s1 + $0x1c0] sm:$0xff]  ;;  %v172_v14 = vld [vmem:[%s6473_s1 + $0x1c8] sm:$0xff] }
  0x2c   :  { %v170_v11 = vld [vmem:[%s6473_s1 + $0x1b8] sm:$0xff]  ;;  %v4872_v12 = vpack.c.bf16 %v1597_v10, %v1596_v9  ;;  %v173_v15 = vld [vmem:[%s6473_s1 + $0x1d0] sm:$0xff]  ;;  %v175_v17 = vld [vmem:[%s6473_s1 + $0x1e0] sm:$0xff] }
  0x2d   :  { %4487 = vmatmul.mubr.msk.f32.gmra.mrb[16].mxu1 %vm40_vm1, %v132_v32  ;;  %4869 = vmatprep.subr.bf16.mxu0 %v4868_v7  ;;  %v174_v16 = vld [vmem:[%s6473_s1 + $0x1d8] sm:$0xff]  ;;  %v176_v18 = vld [vmem:[%s6473_s1 + $0x1e8] sm:$0xff]  ;;  %v177_v19 = vld [vmem:[%s6473_s1 + $0x1f0] sm:$0xff] }
  0x2e   :  { %4489 = vmatprep.mubr.msk.f32.mxu1 %vm40_vm1, %v133_v33  ;;  %4876 = vmatprep.subr.bf16.mxu1 %v4868_v7  ;;  %v178_v20 = vld [vmem:[%s6473_s1 + $0x1f8] sm:$0xff]  ;;  %v179_v21 = vld [vmem:[%s6473_s1 + $0x200] sm:$0xff]  ;;  %v180_v22 = vld [vmem:[%s6473_s1 + $0x208] sm:$0xff] }
  0x2f   :  { %4871 = vmatpush3.bf16.msra.mxu0 %v4868_v7  ;;  %4878 = vmatpush3.bf16.msra.mxu1 %v4868_v7  ;;  %v181_v23 = vld [vmem:[%s6473_s1 + $0x210] sm:$0xff]  ;;  %v182_v24 = vld [vmem:[%s6473_s1 + $0x218] sm:$0xff]  ;;  %v183_v25 = vld [vmem:[%s6473_s1 + $0x220] sm:$0xff] }
  0x30   :  { %4873 = vmatprep.subr.bf16.mxu0 %v4872_v12  ;;  %4877 = vmatprep.subr.bf16.mxu1 %v4872_v12  ;;  %v184_v26 = vld [vmem:[%s6473_s1 + $0x228] sm:$0xff]  ;;  %v185_v27 = vld [vmem:[%s6473_s1 + $0x230] sm:$0xff]  ;;  %v186_v28 = vld [vmem:[%s6473_s1 + $0x238] sm:$0xff] }
  0x31   :  { %4490 = vmatmul.mubr.msk.f32.gmra.mrb[18].mxu1 %vm40_vm1, %v134_v34  ;;  %v187_v29 = vld [vmem:[%s6473_s1 + $0x240] sm:$0xff]  ;;  %v188_v30 = vld [vmem:[%s6473_s1 + $0x248] sm:$0xff]  ;;  %v189_v31 = vld [vmem:[%s6473_s1 + $0x250] sm:$0xff] }
  0x32   :  { %4492 = vmatprep.mubr.msk.f32.mxu1 %vm40_vm1, %v135_v35  ;;  %v190_v32 = vld [vmem:[%s6473_s1 + $0x258] sm:$0xff]  ;;  %v191_v33 = vld [vmem:[%s6473_s1 + $0x260] sm:$0xff]  ;;  %v192_v34 = vld [vmem:[%s6473_s1 + $0x268] sm:$0xff] }
  0x33   :  { %4875 = vmatpush3.bf16.msra.mxu0 %v4872_v12  ;;  %4879 = vmatpush3.bf16.msra.mxu1 %v4872_v12  ;;  %v193_v35 = vld [vmem:[%s6473_s1 + $0x270] sm:$0xff]  ;;  %v223_v5 = vld [vmem:[%s6473_s1 + $0x360] sm:$0xff]  ;;  %v226_v12 = vld [vmem:[%s6473_s1 + $0x378] sm:$0xff] }
  0x34   :  { %v225_v9 = vld [vmem:[%s6473_s1 + $0x370] sm:$0xff] }
  0x35   :  { %4493 = vmatmul.mubr.msk.f32.gmra.mrb[20].mxu1 %vm40_vm1, %v136_v36  ;;  %v194_v36 = vld [vmem:[%s6473_s1 + $0x278] sm:$0xff] }
  0x36   :  { %4495 = vmatprep.mubr.msk.f32.mxu1 %vm40_vm1, %v137_v37  ;;  %v195_v37 = vld [vmem:[%s6473_s1 + $0x280] sm:$0xff] }
  0x39   :  { %4496 = vmatmul.mubr.msk.f32.gmra.mrb[22].mxu1 %vm40_vm1, %v138_v38  ;;  %v196_v38 = vld [vmem:[%s6473_s1 + $0x288] sm:$0xff] }
  0x3a   :  { %4498 = vmatprep.mubr.msk.f32.mxu1 %vm40_vm1, %v139_v39  ;;  %v197_v39 = vld [vmem:[%s6473_s1 + $0x290] sm:$0xff] }
  0x3d   :  { %4499 = vmatmul.mubr.msk.f32.gmra.mrb[24].mxu1 %vm40_vm1, %v140_v40  ;;  %v198_v40 = vld [vmem:[%s6473_s1 + $0x298] sm:$0xff] }
  0x3e   :  { %4501 = vmatprep.mubr.msk.f32.mxu1 %vm40_vm1, %v141_v41  ;;  %v199_v41 = vld [vmem:[%s6473_s1 + $0x2a0] sm:$0xff] }
  0x41   :  { %4502 = vmatmul.mubr.msk.f32.gmra.mrb[26].mxu1 %vm40_vm1, %v142_v42  ;;  %v200_v42 = vld [vmem:[%s6473_s1 + $0x2a8] sm:$0xff] }
  0x42   :  { %4504 = vmatprep.mubr.msk.f32.mxu1 %vm40_vm1, %v143_v43  ;;  %v201_v43 = vld [vmem:[%s6473_s1 + $0x2b0] sm:$0xff] }
  0x45   :  { %4505 = vmatmul.mubr.msk.f32.gmra.mrb[28].mxu1 %vm40_vm1, %v144_v44  ;;  %v202_v44 = vld [vmem:[%s6473_s1 + $0x2b8] sm:$0xff] }
  0x46   :  { %4507 = vmatprep.mubr.msk.f32.mxu1 %vm40_vm1, %v145_v45  ;;  %v203_v45 = vld [vmem:[%s6473_s1 + $0x2c0] sm:$0xff] }
  0x49   :  { %4508 = vmatmul.mubr.msk.f32.gmra.mrb[30].mxu1 %vm40_vm1, %v146_v46  ;;  %v204_v46 = vld [vmem:[%s6473_s1 + $0x2c8] sm:$0xff] }
  0x4a   :  { %4510 = vmatprep.mubr.msk.f32.mxu1 %vm40_vm1, %v147_v47  ;;  %v205_v47 = vld [vmem:[%s6473_s1 + $0x2d0] sm:$0xff] }
  0x4d   :  { %4511 = vmatmul.mubr.msk.f32.gmra.mrb[32].mxu1 %vm40_vm1, %v148_v48  ;;  %v206_v48 = vld [vmem:[%s6473_s1 + $0x2d8] sm:$0xff] }
  0x4e   :  { %4513 = vmatprep.mubr.msk.f32.mxu1 %vm40_vm1, %v149_v49  ;;  %v207_v49 = vld [vmem:[%s6473_s1 + $0x2e0] sm:$0xff] }
  0x51   :  { %4514 = vmatmul.mubr.msk.f32.gmra.mrb[34].mxu1 %vm40_vm1, %v150_v50  ;;  %v208_v50 = vld [vmem:[%s6473_s1 + $0x2e8] sm:$0xff] }
  0x52   :  { %4516 = vmatprep.mubr.msk.f32.mxu1 %vm40_vm1, %v151_v51  ;;  %v209_v51 = vld [vmem:[%s6473_s1 + $0x2f0] sm:$0xff] }
  0x55   :  { %4517 = vmatmul.mubr.msk.f32.gmra.mrb[36].mxu1 %vm40_vm1, %v152_v52  ;;  %v210_v52 = vld [vmem:[%s6473_s1 + $0x2f8] sm:$0xff] }
  0x56   :  { %4519 = vmatprep.mubr.msk.f32.mxu1 %vm40_vm1, %v153_v53  ;;  %v211_v53 = vld [vmem:[%s6473_s1 + $0x300] sm:$0xff] }
  0x59   :  { %4520 = vmatmul.mubr.msk.f32.gmra.mrb[38].mxu1 %vm40_vm1, %v154_v54  ;;  %v212_v54 = vld [vmem:[%s6473_s1 + $0x308] sm:$0xff] }
  0x5a   :  { %4522 = vmatprep.mubr.msk.f32.mxu1 %vm40_vm1, %v155_v55  ;;  %v213_v55 = vld [vmem:[%s6473_s1 + $0x310] sm:$0xff] }
  0x5d   :  { %4523 = vmatmul.mubr.msk.f32.gmra.mrb[40].mxu1 %vm40_vm1, %v156_v56  ;;  %v214_v56 = vld [vmem:[%s6473_s1 + $0x318] sm:$0xff] }
  0x5e   :  { %4525 = vmatprep.mubr.msk.f32.mxu1 %vm40_vm1, %v157_v57  ;;  %v215_v57 = vld [vmem:[%s6473_s1 + $0x320] sm:$0xff] }
  0x61   :  { %4526 = vmatmul.mubr.msk.f32.gmra.mrb[42].mxu1 %vm40_vm1, %v158_v58  ;;  %v216_v58 = vld [vmem:[%s6473_s1 + $0x328] sm:$0xff] }
  0x62   :  { %4528 = vmatprep.mubr.msk.f32.mxu1 %vm40_vm1, %v159_v59  ;;  %v217_v59 = vld [vmem:[%s6473_s1 + $0x330] sm:$0xff] }
  0x65   :  { %4529 = vmatmul.mubr.msk.f32.gmra.mrb[44].mxu1 %vm40_vm1, %v160_v60  ;;  %v218_v60 = vld [vmem:[%s6473_s1 + $0x338] sm:$0xff] }
  0x66   :  { %4531 = vmatprep.mubr.msk.f32.mxu1 %vm40_vm1, %v161_v61  ;;  %v219_v61 = vld [vmem:[%s6473_s1 + $0x340] sm:$0xff] }
  0x69   :  { %4532 = vmatmul.mubr.msk.f32.gmra.mrb[46].mxu1 %vm40_vm1, %v162_v62  ;;  %v220_v62 = vld [vmem:[%s6473_s1 + $0x348] sm:$0xff] }
  0x6a   :  { %4534 = vmatprep.mubr.msk.f32.mxu1 %vm40_vm1, %v163_v63  ;;  %v221_v63 = vld [vmem:[%s6473_s1 + $0x350] sm:$0xff] }
  0x6d   :  { %4535 = vmatmul.mubr.msk.f32.gmra.mrb[48].mxu1 %vm40_vm1, %v164_v0  ;;  %v3916_v0 = vld [vmem:[%s6476_s4] ss:$0 sm:$0xff] }
  0x6e   :  { %4537 = vmatprep.mubr.msk.f32.mxu1 %vm40_vm1, %v165_v1 }
  0x71   :  { %4538 = vmatmul.mubr.msk.f32.gmra.mrb[50].mxu1 %vm40_vm1, %v166_v2  ;;  %v222_v2 = vld [vmem:[%s6473_s1 + $0x358] sm:$0xff] }
  0x72   :  { %4540 = vmatprep.mubr.msk.f32.mxu1 %vm40_vm1, %v167_v3 }
  0x75   :  { %4541 = vmatmul.mubr.msk.f32.gmra.mrb[52].mxu1 %vm40_vm1, %v168_v6 }
  0x76   :  { %4543 = vmatprep.mubr.msk.f32.mxu1 %vm40_vm1, %v169_v8  ;;  %v224_v8 = vld [vmem:[%s6473_s1 + $0x368] sm:$0xff] }
  0x79   :  { %4544 = vmatmul.mubr.msk.f32.gmra.mrb[54].mxu1 %vm40_vm1, %v170_v11 }
  0x7a   :  { %4546 = vmatprep.mubr.msk.f32.mxu1 %vm40_vm1, %v171_v13  ;;  %v227_v13 = vld [vmem:[%s6473_s1 + $0x380] sm:$0xff] }
  0x7d   :  { %4547 = vmatmul.mubr.msk.f32.gmra.mrb[56].mxu1 %vm40_vm1, %v172_v14 }
  0x7e   :  { %4549 = vmatprep.mubr.msk.f32.mxu1 %vm40_vm1, %v173_v15 }
  0x81   :  { %4550 = vmatmul.mubr.msk.f32.gmra.mrb[58].mxu1 %vm40_vm1, %v174_v16 }
  0x82   :  { %4552 = vmatprep.mubr.msk.f32.mxu1 %vm40_vm1, %v175_v17 }
  0x85   :  { %4553 = vmatmul.mubr.msk.f32.gmra.mrb[60].mxu1 %vm40_vm1, %v176_v18 }
  0x86   :  { %4555 = vmatprep.mubr.msk.f32.mxu1 %vm40_vm1, %v177_v19 }
  0x89   :  { %4556 = vmatmul.mubr.msk.f32.gmra.mrb[62].mxu1 %vm40_vm1, %v178_v20  ;;  %v228_v20 = vld [vmem:[%s6473_s1 + $0x388] sm:$0xff] }
  0x8a   :  { %4558 = vmatprep.mubr.msk.f32.mxu1 %vm40_vm1, %v179_v21  ;;  %v229_v21 = vld [vmem:[%s6473_s1 + $0x390] sm:$0xff] }
  0x8d   :  { %4559 = vmatmul.mubr.msk.f32.gmra.mrb[64].mxu1 %vm40_vm1, %v180_v22 }
  0x8e   :  { %4561 = vmatprep.mubr.msk.f32.mxu1 %vm40_vm1, %v181_v23 }
  0x91   :  { %4562 = vmatmul.mubr.msk.f32.gmra.mrb[66].mxu1 %vm40_vm1, %v182_v24 }
  0x92   :  { %4564 = vmatprep.mubr.msk.f32.mxu1 %vm40_vm1, %v183_v25 }
  0x95   :  { %4565 = vmatmul.mubr.msk.f32.gmra.mrb[68].mxu1 %vm40_vm1, %v184_v26  ;;  %v230_v26 = vld [vmem:[%s6473_s1 + $0x398] sm:$0xff] }
  0x96   :  { %4567 = vmatprep.mubr.msk.f32.mxu1 %vm40_vm1, %v185_v27  ;;  %v231_v27 = vld [vmem:[%s6473_s1 + $0x3a0] sm:$0xff] }
  0x99   :  { %4568 = vmatmul.mubr.msk.f32.gmra.mrb[70].mxu1 %vm40_vm1, %v186_v28 }
  0x9a   :  { %4570 = vmatprep.mubr.msk.f32.mxu1 %vm40_vm1, %v187_v29 }
  0x9d   :  { %4571 = vmatmul.mubr.msk.f32.gmra.mrb[72].mxu1 %vm40_vm1, %v188_v30 }
  0x9e   :  { %4573 = vmatprep.mubr.msk.f32.mxu1 %vm40_vm1, %v189_v31 }
  0xa1   :  { %4574 = vmatmul.mubr.msk.f32.gmra.mrb[74].mxu1 %vm40_vm1, %v190_v32  ;;  %v232_v32 = vld [vmem:[%s6473_s1 + $0x3a8] sm:$0xff] }
  0xa2   :  { %4576 = vmatprep.mubr.msk.f32.mxu1 %vm40_vm1, %v191_v33  ;;  %v233_v33 = vld [vmem:[%s6473_s1 + $0x3b0] sm:$0xff] }
  0xa5   :  { %4577 = vmatmul.mubr.msk.f32.gmra.mrb[76].mxu1 %vm40_vm1, %v192_v34 }
  0xa6   :  { %4579 = vmatprep.mubr.msk.f32.mxu1 %vm40_vm1, %v193_v35 }
  0xa9   :  { %4580 = vmatmul.mubr.msk.f32.gmra.mrb[78].mxu1 %vm40_vm1, %v194_v36 }
  0xaa   :  { %4582 = vmatprep.mubr.msk.f32.mxu1 %vm40_vm1, %v195_v37 }
  0xad   :  { %4583 = vmatmul.mubr.msk.f32.gmra.mrb[80].mxu1 %vm40_vm1, %v196_v38 }
  0xae   :  { %4585 = vmatprep.mubr.msk.f32.mxu1 %vm40_vm1, %v197_v39 }
  0xb1   :  { %4586 = vmatmul.mubr.msk.f32.gmra.mrb[82].mxu1 %vm40_vm1, %v198_v40  ;;  %v234_v40 = vld [vmem:[%s6473_s1 + $0x3b8] sm:$0xff] }
  0xb2   :  { %4588 = vmatprep.mubr.msk.f32.mxu1 %vm40_vm1, %v199_v41  ;;  %v235_v41 = vld [vmem:[%s6473_s1 + $0x3c0] sm:$0xff] }
  0xb5   :  { %4589 = vmatmul.mubr.msk.f32.gmra.mrb[84].mxu1 %vm40_vm1, %v200_v42 }
  0xb6   :  { %4591 = vmatprep.mubr.msk.f32.mxu1 %vm40_vm1, %v201_v43 }
  0xb9   :  { %4592 = vmatmul.mubr.msk.f32.gmra.mrb[86].mxu1 %vm40_vm1, %v202_v44 }
  0xba   :  { %4594 = vmatprep.mubr.msk.f32.mxu1 %vm40_vm1, %v203_v45 }
  0xbd   :  { %4595 = vmatmul.mubr.msk.f32.gmra.mrb[88].mxu1 %vm40_vm1, %v204_v46 }
  0xbe   :  { %4597 = vmatprep.mubr.msk.f32.mxu1 %vm40_vm1, %v205_v47  ;;  %v236_v47 = vld [vmem:[%s6473_s1 + $0x3c8] sm:$0xff] }
  0xc1   :  { %4598 = vmatmul.mubr.msk.f32.gmra.mrb[90].mxu1 %vm40_vm1, %v206_v48 }
  0xc2   :  { %4600 = vmatprep.mubr.msk.f32.mxu1 %vm40_vm1, %v207_v49  ;;  %v237_v49 = vld [vmem:[%s6473_s1 + $0x3d0] sm:$0xff] }
  0xc5   :  { %4601 = vmatmul.mubr.msk.f32.gmra.mrb[92].mxu1 %vm40_vm1, %v208_v50 }
  0xc6   :  { %4603 = vmatprep.mubr.msk.f32.mxu1 %vm40_vm1, %v209_v51 }
  0xc9   :  { %4604 = vmatmul.mubr.msk.f32.gmra.mrb[94].mxu1 %vm40_vm1, %v210_v52 }
  0xca   :  { %4606 = vmatprep.mubr.msk.f32.mxu1 %vm40_vm1, %v211_v53 }
  0xcd   :  { %4607 = vmatmul.mubr.msk.f32.gmra.mrb[96].mxu1 %vm40_vm1, %v212_v54 }
  0xce   :  { %4609 = vmatprep.mubr.msk.f32.mxu1 %vm40_vm1, %v213_v55  ;;  %v238_v55 = vld [vmem:[%s6473_s1 + $0x3d8] sm:$0xff] }
  0xd1   :  { %4610 = vmatmul.mubr.msk.f32.gmra.mrb[98].mxu1 %vm40_vm1, %v214_v56 }
  0xd2   :  { %4612 = vmatprep.mubr.msk.f32.mxu1 %vm40_vm1, %v215_v57  ;;  %v239_v57 = vld [vmem:[%s6473_s1 + $0x3e0] sm:$0xff] }
  0xd5   :  { %4613 = vmatmul.mubr.msk.f32.gmra.mrb[100].mxu1 %vm40_vm1, %v216_v58 }
  0xd6   :  { %4615 = vmatprep.mubr.msk.f32.mxu1 %vm40_vm1, %v217_v59 }
  0xd9   :  { %4616 = vmatmul.mubr.msk.f32.gmra.mrb[102].mxu1 %vm40_vm1, %v218_v60 }
  0xda   :  { %4618 = vmatprep.mubr.msk.f32.mxu1 %vm40_vm1, %v219_v61 }
  0xdd   :  { %4619 = vmatmul.mubr.msk.f32.gmra.mrb[104].mxu1 %vm40_vm1, %v220_v62 }
  0xde   :  { %v110_v1 = vpop.f32.mrb[0].mxu0  ;;  %4621 = vmatprep.mubr.msk.f32.mxu1 %vm40_vm1, %v221_v63  ;;  %v240_v63 = vld [vmem:[%s6473_s1 + $0x3e8] sm:$0xff] }
  0xdf   :  { %v111_v3 = vadd.f32 %v3916_v0, %v110_v1  ;;  %v4453_v4 = vpop.f32.mrb[1].mxu0  ;;  %v241_v1 = vld [vmem:[%s6473_s1 + $0x3f0] sm:$0xff] }
  0xe0   :  { %v4464_v6 = vpop.f32.mrb[0].mxu1 }
  0xe1   :  { %114 = vst.msk [vmem:[#allocation2] sm:$0xff] %vm40_vm1, %v111_v3  ;;  %4622 = vmatmul.mubr.msk.f32.gmra.mrb[106].mxu1 %vm40_vm1, %v222_v2  ;;  %v698_v7 = vpop.f32.mrb[1].mxu1 }
  0xe2   :  { %4624 = vmatprep.mubr.msk.f32.mxu1 %vm40_vm1, %v223_v5 }
  0xe4   :  { %v4467_v10 = vpop.f32.mrb[2].mxu1 }
  0xe5   :  { %4625 = vmatmul.mubr.msk.f32.gmra.mrb[108].mxu1 %vm40_vm1, %v224_v8  ;;  %v708_v11 = vpop.f32.mrb[3].mxu1 }
  0xe6   :  { %4627 = vmatprep.mubr.msk.f32.mxu1 %vm40_vm1, %v225_v9 }
  0xe8   :  { %v5706_v14 = vld [vmem:[#allocation2] sm:$0xff]  ;;  %v4470_v15 = vpop.f32.mrb[4].mxu1 }
  0xe9   :  { %v1339_v16 = vadd.f32 %v4464_v6, %v5706_v14  ;;  %v1338_v17 = vadd.f32 %v5706_v14, %v698_v7  ;;  %v718_v18 = vpop.f32.mrb[5].mxu1  ;;  %4628 = vmatmul.mubr.msk.f32.gmra.mrb[110].mxu1 %vm40_vm1, %v226_v12  ;;  %v1340_v19 = vadd.f32 %v5706_v14, %v708_v11  ;;  %v1341_v23 = vadd.f32 %v4467_v10, %v5706_v14  ;;  %v242_v7 = vld [vmem:[%s6473_s1 + $0x3f8] sm:$0xff]  ;;  %s5176_s1 = smov [#allocation3]  }
  0xea   :  { %4630 = vmatprep.mubr.msk.f32.mxu1 %vm40_vm1, %v227_v13  ;;  %v1342_v25 = vadd.f32 %v5706_v14, %v718_v18  ;;  %v1343_v29 = vadd.f32 %v4470_v15, %v5706_v14  ;;  %s3907_s27 = sshll.u32 %s5176_s1, 4  ;;  %s3908_s27 = int_to_ptr.vmem [resolvable:$true] %s3907_s27 }
  0xeb   :  { %4887 = vtanh.f32 %v1339_v16  ;;  %s5148_s28 = scalar_lea.vmem %s3908_s27, 128  ;;  %p5153_p1 = scmp.lt.s32.totalorder %s3908_s27, %s3908_s27 }
  0xec   :  { %4889 = vtanh.f32 %v1338_v17  ;;  %v4473_v22 = vpop.f32.mrb[6].mxu1  ;;  %p5149_p0 = scmp.ne.s32.totalorder %s3908_s27, %s5148_s28  ;;  %p5154_p2 = scmp.lt.s32.totalorder %s5148_s28, %s5148_s28 }
  0xed   :  { %v728_v24 = vpop.f32.mrb[7].mxu1  ;;  %4631 = vmatmul.mubr.msk.f32.gmra.mrb[112].mxu1 %vm40_vm1, %v228_v20  ;;  %4891 = vtanh.f32 %v1340_v19  ;;  %v1345_v36 = vadd.f32 %v4473_v22, %v5706_v14 }
  0xee   :  { %4633 = vmatprep.mubr.msk.f32.mxu1 %vm40_vm1, %v229_v21  ;;  %4893 = vtanh.f32 %v1341_v23  ;;  %v1344_v31 = vadd.f32 %v5706_v14, %v728_v24  ;;  %p5155_p3 = por %p5154_p2, %p5153_p1 }
  0xef   :  { %4895 = vtanh.f32 %v1342_v25 }
  0xf0   :  { %v4476_v28 = vpop.f32.mrb[8].mxu1  ;;  %4897 = vtanh.f32 %v1343_v29  ;;  %p5156_p4 = pnand %p5155_p3, %p5149_p0 }
  0xf1   :  { %v738_v30 = vpop.f32.mrb[9].mxu1  ;;  %4634 = vmatmul.mubr.msk.f32.gmra.mrb[114].mxu1 %vm40_vm1, %v230_v26  ;;  %4899 = vtanh.f32 %v1344_v31  ;;  %v1347_v44 = vadd.f32 %v4476_v28, %v5706_v14 }
  0xf2   :  { %4636 = vmatprep.mubr.msk.f32.mxu1 %vm40_vm1, %v231_v27  ;;  %v1346_v39 = vadd.f32 %v5706_v14, %v738_v30  ;;  %4901 = vtanh.f32 %v1345_v36 }
  0xf4   :  { %v4479_v34 = vpop.f32.mrb[10].mxu1  ;;  %4903 = vtanh.f32 %v1346_v39 }
  0xf5   :  { %v4888_v35 = vpop.eup %4887  ;;  %v748_v37 = vpop.f32.mrb[11].mxu1  ;;  %4637 = vmatmul.mubr.msk.f32.gmra.mrb[116].mxu1 %vm40_vm1, %v232_v32  ;;  %4905 = vtanh.f32 %v1347_v44  ;;  %v1349_v52 = vadd.f32 %v4479_v34, %v5706_v14 }
  0xf6   :  { %v4890_v38 = vpop.eup %4889  ;;  %4639 = vmatprep.mubr.msk.f32.mxu1 %vm40_vm1, %v233_v33  ;;  %v1348_v46 = vadd.f32 %v5706_v14, %v748_v37 }
  0xf7   :  { %4662 = vmatprep.mubr.msk.f32.mxu0 %vm40_vm1, %v4890_v38  ;;  %v4892_v42 = vpop.eup %4891 }
  0xf8   :  { %v4482_v43 = vpop.f32.mrb[12].mxu1  ;;  %4663 = vmatmul.mubr.msk.f32.vlgmr.msra.gmra.mrb[2].mxu0 %vm40_vm1, %v4888_v35  ;;  %v4894_v48 = vpop.eup %4893  ;;  %4907 = vtanh.f32 %v1348_v46 }
  0xf9   :  { %v758_v45 = vpop.f32.mrb[13].mxu1  ;;  %4640 = vmatmul.mubr.msk.f32.gmra.mrb[118].mxu1 %vm40_vm1, %v234_v40  ;;  %4665 = vmatprep.mubr.msk.f32.mxu0 %vm40_vm1, %v4892_v42  ;;  %v4896_v50 = vpop.eup %4895  ;;  %4909 = vtanh.f32 %v1349_v52  ;;  %v1351_v60 = vadd.f32 %v4482_v43, %v5706_v14 }
  0xfa   :  { %4642 = vmatprep.mubr.msk.f32.mxu1 %vm40_vm1, %v235_v41  ;;  %v1350_v54 = vadd.f32 %v5706_v14, %v758_v45  ;;  %v4898_v56 = vpop.eup %4897 }
  0xfb   :  { %v4900_v58 = vpop.eup %4899 }
  0xfc   :  { %v4485_v51 = vpop.f32.mrb[14].mxu1  ;;  %4666 = vmatmul.mubr.msk.f32.gmra.mrb[4].mxu0 %vm40_vm1, %v4894_v48  ;;  %4911 = vtanh.f32 %v1350_v54  ;;  %v4902_v0 = vpop.eup %4901 }
  0xfd   :  { %v768_v53 = vpop.f32.mrb[15].mxu1  ;;  %4643 = vmatmul.mubr.msk.f32.gmra.mrb[120].mxu1 %vm40_vm1, %v236_v47  ;;  %4668 = vmatprep.mubr.msk.f32.mxu0 %vm40_vm1, %v4896_v50  ;;  %4913 = vtanh.f32 %v1351_v60  ;;  %v1353_v4 = vadd.f32 %v4485_v51, %v5706_v14 }
  0xfe   :  { %4645 = vmatprep.mubr.msk.f32.mxu1 %vm40_vm1, %v237_v49  ;;  %v1352_v62 = vadd.f32 %v5706_v14, %v768_v53  ;;  %v4904_v2 = vpop.eup %4903 }
  0xff   :  { %v4906_v8 = vpop.eup %4905 }
 0x100   :  { %v4488_v59 = vpop.f32.mrb[16].mxu1  ;;  %4669 = vmatmul.mubr.msk.f32.gmra.mrb[6].mxu0 %vm40_vm1, %v4898_v56  ;;  %4915 = vtanh.f32 %v1352_v62 }
 0x101   :  { %v778_v61 = vpop.f32.mrb[17].mxu1  ;;  %4646 = vmatmul.mubr.msk.f32.gmra.mrb[122].mxu1 %vm40_vm1, %v238_v55  ;;  %4671 = vmatprep.mubr.msk.f32.mxu0 %vm40_vm1, %v4900_v58  ;;  %4917 = vtanh.f32 %v1353_v4  ;;  %v1355_v11 = vadd.f32 %v4488_v59, %v5706_v14 }
 0x102   :  { %4648 = vmatprep.mubr.msk.f32.mxu1 %vm40_vm1, %v239_v57  ;;  %v1354_v6 = vadd.f32 %v5706_v14, %v778_v61  ;;  %v4908_v9 = vpop.eup %4907 }
 0x103   :  { %v4910_v15 = vpop.eup %4909 }
 0x104   :  { %v4491_v3 = vpop.f32.mrb[18].mxu1  ;;  %4672 = vmatmul.mubr.msk.f32.gmra.mrb[8].mxu0 %vm40_vm1, %v4902_v0  ;;  %4919 = vtanh.f32 %v1354_v6 }
 0x105   :  { %v788_v5 = vpop.f32.mrb[19].mxu1  ;;  %4649 = vmatmul.mubr.msk.f32.gmra.mrb[124].mxu1 %vm40_vm1, %v240_v63  ;;  %4674 = vmatprep.mubr.msk.f32.mxu0 %vm40_vm1, %v4904_v2  ;;  %4921 = vtanh.f32 %v1355_v11  ;;  %v1357_v18 = vadd.f32 %v4491_v3, %v5706_v14 }
 0x106   :  { %4651 = vmatprep.mubr.msk.f32.mxu1 %vm40_vm1, %v241_v1  ;;  %v1356_v13 = vadd.f32 %v5706_v14, %v788_v5  ;;  %v4912_v16 = vpop.eup %4911 }
 0x107   :  { %v4914_v21 = vpop.eup %4913 }
 0x108   :  { %v4494_v10 = vpop.f32.mrb[20].mxu1  ;;  %4675 = vmatmul.mubr.msk.f32.gmra.mrb[10].mxu0 %vm40_vm1, %v4906_v8  ;;  %4923 = vtanh.f32 %v1356_v13 }
 0x109   :  { %v798_v12 = vpop.f32.mrb[21].mxu1  ;;  %4652 = vmatmul.mubr.msk.f32.gmra.mrb[126].mxu1 %vm40_vm1, %v242_v7  ;;  %4677 = vmatprep.mubr.msk.f32.mxu0 %vm40_vm1, %v4908_v9  ;;  %4925 = vtanh.f32 %v1357_v18  ;;  %v1359_v24 = vadd.f32 %v4494_v10, %v5706_v14 }
 0x10a   :  { %v1358_v20 = vadd.f32 %v5706_v14, %v798_v12  ;;  %v4916_v22 = vpop.eup %4915 }
 0x10b   :  { %v4918_v27 = vpop.eup %4917 }
 0x10c   :  { %v4497_v17 = vpop.f32.mrb[22].mxu1  ;;  %4678 = vmatmul.mubr.msk.f32.gmra.mrb[12].mxu0 %vm40_vm1, %v4910_v15  ;;  %4927 = vtanh.f32 %v1358_v20 }
 0x10d   :  { %v808_v19 = vpop.f32.mrb[23].mxu1  ;;  %4680 = vmatprep.mubr.msk.f32.mxu0 %vm40_vm1, %v4912_v16  ;;  %4929 = vtanh.f32 %v1359_v24  ;;  %v1361_v30 = vadd.f32 %v4497_v17, %v5706_v14 }
 0x10e   :  { %v1360_v26 = vadd.f32 %v5706_v14, %v808_v19  ;;  %v4920_v28 = vpop.eup %4919 }
 0x10f   :  { %v4922_v33 = vpop.eup %4921 }
 0x110   :  { %v4500_v23 = vpop.f32.mrb[24].mxu1  ;;  %4681 = vmatmul.mubr.msk.f32.gmra.mrb[14].mxu0 %vm40_vm1, %v4914_v21  ;;  %4931 = vtanh.f32 %v1360_v26 }
 0x111   :  { %v818_v25 = vpop.f32.mrb[25].mxu1  ;;  %4683 = vmatprep.mubr.msk.f32.mxu0 %vm40_vm1, %v4916_v22  ;;  %4933 = vtanh.f32 %v1361_v30  ;;  %v1363_v36 = vadd.f32 %v4500_v23, %v5706_v14 }
 0x112   :  { %v1362_v32 = vadd.f32 %v5706_v14, %v818_v25  ;;  %v4924_v34 = vpop.eup %4923 }
 0x113   :  { %v4926_v39 = vpop.eup %4925 }
 0x114   :  { %v4503_v29 = vpop.f32.mrb[26].mxu1  ;;  %4684 = vmatmul.mubr.msk.f32.gmra.mrb[16].mxu0 %vm40_vm1, %v4918_v27  ;;  %4935 = vtanh.f32 %v1362_v32 }
 0x115   :  { %v828_v31 = vpop.f32.mrb[27].mxu1  ;;  %4686 = vmatprep.mubr.msk.f32.mxu0 %vm40_vm1, %v4920_v28  ;;  %4937 = vtanh.f32 %v1363_v36  ;;  %v1365_v42 = vadd.f32 %v4503_v29, %v5706_v14 }
 0x116   :  { %v1364_v38 = vadd.f32 %v5706_v14, %v828_v31  ;;  %v4928_v40 = vpop.eup %4927 }
 0x117   :  { %v4930_v45 = vpop.eup %4929 }
 0x118   :  { %v4506_v35 = vpop.f32.mrb[28].mxu1  ;;  %4687 = vmatmul.mubr.msk.f32.gmra.mrb[18].mxu0 %vm40_vm1, %v4922_v33  ;;  %4939 = vtanh.f32 %v1364_v38 }
 0x119   :  { %v838_v37 = vpop.f32.mrb[29].mxu1  ;;  %4689 = vmatprep.mubr.msk.f32.mxu0 %vm40_vm1, %v4924_v34  ;;  %4941 = vtanh.f32 %v1365_v42  ;;  %v1367_v48 = vadd.f32 %v4506_v35, %v5706_v14 }
 0x11a   :  { %v1366_v44 = vadd.f32 %v5706_v14, %v838_v37  ;;  %v4932_v46 = vpop.eup %4931 }
 0x11b   :  { %v4934_v51 = vpop.eup %4933 }
 0x11c   :  { %v4509_v41 = vpop.f32.mrb[30].mxu1  ;;  %4690 = vmatmul.mubr.msk.f32.gmra.mrb[20].mxu0 %vm40_vm1, %v4926_v39  ;;  %4943 = vtanh.f32 %v1366_v44 }
 0x11d   :  { %v848_v43 = vpop.f32.mrb[31].mxu1  ;;  %4692 = vmatprep.mubr.msk.f32.mxu0 %vm40_vm1, %v4928_v40  ;;  %4945 = vtanh.f32 %v1367_v48  ;;  %v1369_v54 = vadd.f32 %v4509_v41, %v5706_v14 }
 0x11e   :  { %v1368_v50 = vadd.f32 %v5706_v14, %v848_v43  ;;  %v4936_v52 = vpop.eup %4935 }
 0x11f   :  { %v4938_v57 = vpop.eup %4937 }
 0x120   :  { %v4512_v47 = vpop.f32.mrb[32].mxu1  ;;  %4693 = vmatmul.mubr.msk.f32.gmra.mrb[22].mxu0 %vm40_vm1, %v4930_v45  ;;  %4947 = vtanh.f32 %v1368_v50 }
 0x121   :  { %v858_v49 = vpop.f32.mrb[33].mxu1  ;;  %4695 = vmatprep.mubr.msk.f32.mxu0 %vm40_vm1, %v4932_v46  ;;  %4949 = vtanh.f32 %v1369_v54  ;;  %v1371_v60 = vadd.f32 %v4512_v47, %v5706_v14 }
 0x122   :  { %v1370_v56 = vadd.f32 %v5706_v14, %v858_v49  ;;  %v4940_v58 = vpop.eup %4939 }
 0x123   :  { %v4942_v63 = vpop.eup %4941 }
 0x124   :  { %v4515_v53 = vpop.f32.mrb[34].mxu1  ;;  %4696 = vmatmul.mubr.msk.f32.gmra.mrb[24].mxu0 %vm40_vm1, %v4934_v51  ;;  %4951 = vtanh.f32 %v1370_v56 }
 0x125   :  { %v868_v55 = vpop.f32.mrb[35].mxu1  ;;  %4698 = vmatprep.mubr.msk.f32.mxu0 %vm40_vm1, %v4936_v52  ;;  %4953 = vtanh.f32 %v1371_v60  ;;  %v1373_v2 = vadd.f32 %v4515_v53, %v5706_v14  ;;  %v5175_v53 = vmov 0  }
 0x126   :  { %v1372_v62 = vadd.f32 %v5706_v14, %v868_v55  ;;  %v4944_v0 = vpop.eup %4943  ;;  %4885 = vset.pattern.permute.xlu0 %v5175_v53  ;;  %4886 = vset.pattern.permute.xlu1 %v5175_v53 }
 0x127   :  { %v4946_v5 = vpop.eup %4945 }
 0x128   :  { %v4518_v59 = vpop.f32.mrb[36].mxu1  ;;  %4699 = vmatmul.mubr.msk.f32.gmra.mrb[26].mxu0 %vm40_vm1, %v4938_v57  ;;  %4955 = vtanh.f32 %v1372_v62 }
 0x129   :  { %v878_v61 = vpop.f32.mrb[37].mxu1  ;;  %4701 = vmatprep.mubr.msk.f32.mxu0 %vm40_vm1, %v4940_v58  ;;  %4957 = vtanh.f32 %v1373_v2  ;;  %v1375_v8 = vadd.f32 %v4518_v59, %v5706_v14 }
 0x12a   :  { %v1374_v4 = vadd.f32 %v5706_v14, %v878_v61  ;;  %v4948_v6 = vpop.eup %4947 }
 0x12b   :  { %v4950_v11 = vpop.eup %4949 }
 0x12c   :  { %v4521_v1 = vpop.f32.mrb[38].mxu1  ;;  %4702 = vmatmul.mubr.msk.f32.gmra.mrb[28].mxu0 %vm40_vm1, %v4942_v63  ;;  %4959 = vtanh.f32 %v1374_v4 }
 0x12d   :  { %v888_v3 = vpop.f32.mrb[39].mxu1  ;;  %4704 = vmatprep.mubr.msk.f32.mxu0 %vm40_vm1, %v4944_v0  ;;  %4961 = vtanh.f32 %v1375_v8  ;;  %v1377_v15 = vadd.f32 %v4521_v1, %v5706_v14 }
 0x12e   :  { %v1376_v10 = vadd.f32 %v5706_v14, %v888_v3  ;;  %v4952_v12 = vpop.eup %4951 }
 0x12f   :  { %v4954_v18 = vpop.eup %4953 }
 0x130   :  { %v4524_v7 = vpop.f32.mrb[40].mxu1  ;;  %4705 = vmatmul.mubr.msk.f32.gmra.mrb[30].mxu0 %vm40_vm1, %v4946_v5  ;;  %4963 = vtanh.f32 %v1376_v10 }
 0x131   :  { %v898_v9 = vpop.f32.mrb[41].mxu1  ;;  %4707 = vmatprep.mubr.msk.f32.mxu0 %vm40_vm1, %v4948_v6  ;;  %4965 = vtanh.f32 %v1377_v15  ;;  %v1379_v21 = vadd.f32 %v4524_v7, %v5706_v14 }
 0x132   :  { %v1378_v17 = vadd.f32 %v5706_v14, %v898_v9  ;;  %v4956_v19 = vpop.eup %4955 }
 0x133   :  { %v4958_v24 = vpop.eup %4957 }
 0x134   :  { %v4527_v13 = vpop.f32.mrb[42].mxu1  ;;  %4708 = vmatmul.mubr.msk.f32.gmra.mrb[32].mxu0 %vm40_vm1, %v4950_v11  ;;  %4967 = vtanh.f32 %v1378_v17 }
 0x135   :  { %v908_v16 = vpop.f32.mrb[43].mxu1  ;;  %4710 = vmatprep.mubr.msk.f32.mxu0 %vm40_vm1, %v4952_v12  ;;  %4969 = vtanh.f32 %v1379_v21  ;;  %v1381_v27 = vadd.f32 %v4527_v13, %v5706_v14 }
 0x136   :  { %v1380_v23 = vadd.f32 %v5706_v14, %v908_v16  ;;  %v4960_v25 = vpop.eup %4959 }
 0x137   :  { %v4962_v30 = vpop.eup %4961 }
 0x138   :  { %v4530_v20 = vpop.f32.mrb[44].mxu1  ;;  %4711 = vmatmul.mubr.msk.f32.gmra.mrb[34].mxu0 %vm40_vm1, %v4954_v18  ;;  %4971 = vtanh.f32 %v1380_v23 }
 0x139   :  { %v918_v22 = vpop.f32.mrb[45].mxu1  ;;  %4713 = vmatprep.mubr.msk.f32.mxu0 %vm40_vm1, %v4956_v19  ;;  %4973 = vtanh.f32 %v1381_v27  ;;  %v1383_v33 = vadd.f32 %v4530_v20, %v5706_v14 }
 0x13a   :  { %v1382_v29 = vadd.f32 %v5706_v14, %v918_v22  ;;  %v4964_v31 = vpop.eup %4963 }
 0x13b   :  { %v4966_v36 = vpop.eup %4965 }
 0x13c   :  { %v4533_v26 = vpop.f32.mrb[46].mxu1  ;;  %4714 = vmatmul.mubr.msk.f32.gmra.mrb[36].mxu0 %vm40_vm1, %v4958_v24  ;;  %4975 = vtanh.f32 %v1382_v29 }
 0x13d   :  { %v928_v28 = vpop.f32.mrb[47].mxu1  ;;  %4716 = vmatprep.mubr.msk.f32.mxu0 %vm40_vm1, %v4960_v25  ;;  %4977 = vtanh.f32 %v1383_v33  ;;  %v1385_v39 = vadd.f32 %v4533_v26, %v5706_v14 }
 0x13e   :  { %v1384_v35 = vadd.f32 %v5706_v14, %v928_v28  ;;  %v4968_v37 = vpop.eup %4967 }
 0x13f   :  { %v4970_v42 = vpop.eup %4969 }
 0x140   :  { %v4536_v32 = vpop.f32.mrb[48].mxu1  ;;  %4717 = vmatmul.mubr.msk.f32.gmra.mrb[38].mxu0 %vm40_vm1, %v4962_v30  ;;  %4979 = vtanh.f32 %v1384_v35 }
 0x141   :  { %v938_v34 = vpop.f32.mrb[49].mxu1  ;;  %4719 = vmatprep.mubr.msk.f32.mxu0 %vm40_vm1, %v4964_v31  ;;  %4981 = vtanh.f32 %v1385_v39  ;;  %v1387_v45 = vadd.f32 %v4536_v32, %v5706_v14 }
 0x142   :  { %v1386_v41 = vadd.f32 %v5706_v14, %v938_v34  ;;  %v4972_v43 = vpop.eup %4971 }
 0x143   :  { %v4974_v48 = vpop.eup %4973 }
 0x144   :  { %v4539_v38 = vpop.f32.mrb[50].mxu1  ;;  %4720 = vmatmul.mubr.msk.f32.gmra.mrb[40].mxu0 %vm40_vm1, %v4966_v36  ;;  %4983 = vtanh.f32 %v1386_v41 }
 0x145   :  { %v948_v40 = vpop.f32.mrb[51].mxu1  ;;  %4722 = vmatprep.mubr.msk.f32.mxu0 %vm40_vm1, %v4968_v37  ;;  %4985 = vtanh.f32 %v1387_v45  ;;  %v1389_v51 = vadd.f32 %v4539_v38, %v5706_v14 }
 0x146   :  { %v1388_v47 = vadd.f32 %v5706_v14, %v948_v40  ;;  %v4976_v49 = vpop.eup %4975 }
 0x147   :  { %v4978_v55 = vpop.eup %4977 }
 0x148   :  { %v4542_v44 = vpop.f32.mrb[52].mxu1  ;;  %4723 = vmatmul.mubr.msk.f32.gmra.mrb[42].mxu0 %vm40_vm1, %v4970_v42  ;;  %4987 = vtanh.f32 %v1388_v47 }
 0x149   :  { %v958_v46 = vpop.f32.mrb[53].mxu1  ;;  %4725 = vmatprep.mubr.msk.f32.mxu0 %vm40_vm1, %v4972_v43  ;;  %4989 = vtanh.f32 %v1389_v51  ;;  %v1391_v58 = vadd.f32 %v4542_v44, %v5706_v14 }
 0x14a   :  { %v1390_v54 = vadd.f32 %v5706_v14, %v958_v46  ;;  %v4980_v56 = vpop.eup %4979 }
 0x14b   :  { %v4982_v61 = vpop.eup %4981 }
 0x14c   :  { %v4545_v50 = vpop.f32.mrb[54].mxu1  ;;  %4726 = vmatmul.mubr.msk.f32.gmra.mrb[44].mxu0 %vm40_vm1, %v4974_v48  ;;  %4991 = vtanh.f32 %v1390_v54 }
 0x14d   :  { %v968_v52 = vpop.f32.mrb[55].mxu1  ;;  %4728 = vmatprep.mubr.msk.f32.mxu0 %vm40_vm1, %v4976_v49  ;;  %4993 = vtanh.f32 %v1391_v58  ;;  %v1393_v0 = vadd.f32 %v4545_v50, %v5706_v14 }
 0x14e   :  { %v1392_v60 = vadd.f32 %v5706_v14, %v968_v52  ;;  %v4984_v62 = vpop.eup %4983 }
 0x14f   :  { %v4986_v3 = vpop.eup %4985 }
 0x150   :  { %v4548_v57 = vpop.f32.mrb[56].mxu1  ;;  %4729 = vmatmul.mubr.msk.f32.gmra.mrb[46].mxu0 %vm40_vm1, %v4978_v55  ;;  %4995 = vtanh.f32 %v1392_v60 }
 0x151   :  { %v978_v59 = vpop.f32.mrb[57].mxu1  ;;  %4731 = vmatprep.mubr.msk.f32.mxu0 %vm40_vm1, %v4980_v56  ;;  %4997 = vtanh.f32 %v1393_v0  ;;  %v1395_v6 = vadd.f32 %v4548_v57, %v5706_v14 }
 0x152   :  { %v1394_v2 = vadd.f32 %v5706_v14, %v978_v59  ;;  %v4988_v4 = vpop.eup %4987 }
 0x153   :  { %v4990_v9 = vpop.eup %4989 }
 0x154   :  { %v4551_v63 = vpop.f32.mrb[58].mxu1  ;;  %4732 = vmatmul.mubr.msk.f32.gmra.mrb[48].mxu0 %vm40_vm1, %v4982_v61  ;;  %4999 = vtanh.f32 %v1394_v2 }
 0x155   :  { %v988_v1 = vpop.f32.mrb[59].mxu1  ;;  %4734 = vmatprep.mubr.msk.f32.mxu0 %vm40_vm1, %v4984_v62  ;;  %5001 = vtanh.f32 %v1395_v6  ;;  %v1397_v12 = vadd.f32 %v4551_v63, %v5706_v14 }
 0x156   :  { %v1396_v8 = vadd.f32 %v5706_v14, %v988_v1  ;;  %v4992_v10 = vpop.eup %4991 }
 0x157   :  { %v4994_v16 = vpop.eup %4993 }
 0x158   :  { %v4554_v5 = vpop.f32.mrb[60].mxu1  ;;  %4735 = vmatmul.mubr.msk.f32.gmra.mrb[50].mxu0 %vm40_vm1, %v4986_v3  ;;  %5003 = vtanh.f32 %v1396_v8 }
 0x159   :  { %v998_v7 = vpop.f32.mrb[61].mxu1  ;;  %4737 = vmatprep.mubr.msk.f32.mxu0 %vm40_vm1, %v4988_v4  ;;  %5005 = vtanh.f32 %v1397_v12  ;;  %v1399_v19 = vadd.f32 %v4554_v5, %v5706_v14 }
 0x15a   :  { %v1398_v15 = vadd.f32 %v5706_v14, %v998_v7  ;;  %v4996_v17 = vpop.eup %4995 }
 0x15b   :  { %v4998_v22 = vpop.eup %4997 }
 0x15c   :  { %v4557_v11 = vpop.f32.mrb[62].mxu1  ;;  %4738 = vmatmul.mubr.msk.f32.gmra.mrb[52].mxu0 %vm40_vm1, %v4990_v9  ;;  %5007 = vtanh.f32 %v1398_v15 }
 0x15d   :  { %v1008_v13 = vpop.f32.mrb[63].mxu1  ;;  %4740 = vmatprep.mubr.msk.f32.mxu0 %vm40_vm1, %v4992_v10  ;;  %5009 = vtanh.f32 %v1399_v19  ;;  %v1401_v25 = vadd.f32 %v4557_v11, %v5706_v14 }
 0x15e   :  { %v1400_v21 = vadd.f32 %v5706_v14, %v1008_v13  ;;  %v5000_v23 = vpop.eup %4999 }
 0x15f   :  { %v5002_v28 = vpop.eup %5001 }
 0x160   :  { %v4560_v18 = vpop.f32.mrb[64].mxu1  ;;  %4741 = vmatmul.mubr.msk.f32.gmra.mrb[54].mxu0 %vm40_vm1, %v4994_v16  ;;  %5011 = vtanh.f32 %v1400_v21 }
 0x161   :  { %v1018_v20 = vpop.f32.mrb[65].mxu1  ;;  %4743 = vmatprep.mubr.msk.f32.mxu0 %vm40_vm1, %v4996_v17  ;;  %5013 = vtanh.f32 %v1401_v25  ;;  %v1403_v31 = vadd.f32 %v4560_v18, %v5706_v14 }
 0x162   :  { %v1402_v27 = vadd.f32 %v5706_v14, %v1018_v20  ;;  %v5004_v29 = vpop.eup %5003 }
 0x163   :  { %v5006_v34 = vpop.eup %5005 }
 0x164   :  { %v4563_v24 = vpop.f32.mrb[66].mxu1  ;;  %4744 = vmatmul.mubr.msk.f32.gmra.mrb[56].mxu0 %vm40_vm1, %v4998_v22  ;;  %5015 = vtanh.f32 %v1402_v27 }
 0x165   :  { %v1028_v26 = vpop.f32.mrb[67].mxu1  ;;  %4746 = vmatprep.mubr.msk.f32.mxu0 %vm40_vm1, %v5000_v23  ;;  %5017 = vtanh.f32 %v1403_v31  ;;  %v1405_v37 = vadd.f32 %v4563_v24, %v5706_v14 }
 0x166   :  { %v1404_v33 = vadd.f32 %v5706_v14, %v1028_v26  ;;  %v5008_v35 = vpop.eup %5007 }
 0x167   :  { %v5010_v40 = vpop.eup %5009 }
 0x168   :  { %v4566_v30 = vpop.f32.mrb[68].mxu1  ;;  %4747 = vmatmul.mubr.msk.f32.gmra.mrb[58].mxu0 %vm40_vm1, %v5002_v28  ;;  %5019 = vtanh.f32 %v1404_v33 }
 0x169   :  { %v1038_v32 = vpop.f32.mrb[69].mxu1  ;;  %4749 = vmatprep.mubr.msk.f32.mxu0 %vm40_vm1, %v5004_v29  ;;  %5021 = vtanh.f32 %v1405_v37  ;;  %v1407_v43 = vadd.f32 %v4566_v30, %v5706_v14 }
 0x16a   :  { %v1406_v39 = vadd.f32 %v5706_v14, %v1038_v32  ;;  %v5012_v41 = vpop.eup %5011 }
 0x16b   :  { %v5014_v46 = vpop.eup %5013 }
 0x16c   :  { %v4569_v36 = vpop.f32.mrb[70].mxu1  ;;  %4750 = vmatmul.mubr.msk.f32.gmra.mrb[60].mxu0 %vm40_vm1, %v5006_v34  ;;  %5023 = vtanh.f32 %v1406_v39 }
 0x16d   :  { %v1048_v38 = vpop.f32.mrb[71].mxu1  ;;  %4752 = vmatprep.mubr.msk.f32.mxu0 %vm40_vm1, %v5008_v35  ;;  %5025 = vtanh.f32 %v1407_v43  ;;  %v1409_v49 = vadd.f32 %v4569_v36, %v5706_v14 }
 0x16e   :  { %v1408_v45 = vadd.f32 %v5706_v14, %v1048_v38  ;;  %v5016_v47 = vpop.eup %5015 }
 0x16f   :  { %v5018_v52 = vpop.eup %5017 }
 0x170   :  { %v4572_v42 = vpop.f32.mrb[72].mxu1  ;;  %4753 = vmatmul.mubr.msk.f32.gmra.mrb[62].mxu0 %vm40_vm1, %v5010_v40  ;;  %5027 = vtanh.f32 %v1408_v45 }
 0x171   :  { %v1058_v44 = vpop.f32.mrb[73].mxu1  ;;  %4755 = vmatprep.mubr.msk.f32.mxu0 %vm40_vm1, %v5012_v41  ;;  %5029 = vtanh.f32 %v1409_v49  ;;  %v1411_v55 = vadd.f32 %v4572_v42, %v5706_v14 }
 0x172   :  { %v1410_v51 = vadd.f32 %v5706_v14, %v1058_v44  ;;  %v5020_v53 = vpop.eup %5019 }
 0x173   :  { %v5022_v58 = vpop.eup %5021 }
 0x174   :  { %v4575_v48 = vpop.f32.mrb[74].mxu1  ;;  %4756 = vmatmul.mubr.msk.f32.gmra.mrb[64].mxu0 %vm40_vm1, %v5014_v46  ;;  %5031 = vtanh.f32 %v1410_v51 }
 0x175   :  { %v1068_v50 = vpop.f32.mrb[75].mxu1  ;;  %4758 = vmatprep.mubr.msk.f32.mxu0 %vm40_vm1, %v5016_v47  ;;  %5033 = vtanh.f32 %v1411_v55  ;;  %v1413_v61 = vadd.f32 %v4575_v48, %v5706_v14 }
 0x176   :  { %v1412_v57 = vadd.f32 %v5706_v14, %v1068_v50  ;;  %v5024_v59 = vpop.eup %5023 }
 0x177   :  { %v5026_v0 = vpop.eup %5025 }
 0x178   :  { %v4578_v54 = vpop.f32.mrb[76].mxu1  ;;  %4759 = vmatmul.mubr.msk.f32.gmra.mrb[66].mxu0 %vm40_vm1, %v5018_v52  ;;  %5035 = vtanh.f32 %v1412_v57 }
 0x179   :  { %v1078_v56 = vpop.f32.mrb[77].mxu1  ;;  %4761 = vmatprep.mubr.msk.f32.mxu0 %vm40_vm1, %v5020_v53  ;;  %5037 = vtanh.f32 %v1413_v61  ;;  %v1415_v3 = vadd.f32 %v4578_v54, %v5706_v14 }
 0x17a   :  { %v1414_v63 = vadd.f32 %v5706_v14, %v1078_v56  ;;  %v5028_v1 = vpop.eup %5027 }
 0x17b   :  { %v5030_v6 = vpop.eup %5029 }
 0x17c   :  { %v4581_v60 = vpop.f32.mrb[78].mxu1  ;;  %4762 = vmatmul.mubr.msk.f32.gmra.mrb[68].mxu0 %vm40_vm1, %v5022_v58  ;;  %5039 = vtanh.f32 %v1414_v63 }
 0x17d   :  { %v1088_v62 = vpop.f32.mrb[79].mxu1  ;;  %4764 = vmatprep.mubr.msk.f32.mxu0 %vm40_vm1, %v5024_v59  ;;  %5041 = vtanh.f32 %v1415_v3  ;;  %v1417_v9 = vadd.f32 %v4581_v60, %v5706_v14 }
 0x17e   :  { %v1416_v5 = vadd.f32 %v5706_v14, %v1088_v62  ;;  %v5032_v7 = vpop.eup %5031 }
 0x17f   :  { %v5034_v12 = vpop.eup %5033 }
 0x180   :  { %v4584_v2 = vpop.f32.mrb[80].mxu1  ;;  %4765 = vmatmul.mubr.msk.f32.gmra.mrb[70].mxu0 %vm40_vm1, %v5026_v0  ;;  %5043 = vtanh.f32 %v1416_v5 }
 0x181   :  { %v1098_v4 = vpop.f32.mrb[81].mxu1  ;;  %4767 = vmatprep.mubr.msk.f32.mxu0 %vm40_vm1, %v5028_v1  ;;  %5045 = vtanh.f32 %v1417_v9  ;;  %v1419_v16 = vadd.f32 %v4584_v2, %v5706_v14 }
 0x182   :  { %v1418_v11 = vadd.f32 %v5706_v14, %v1098_v4  ;;  %v5036_v13 = vpop.eup %5035 }
 0x183   :  { %v5038_v19 = vpop.eup %5037 }
 0x184   :  { %v4587_v8 = vpop.f32.mrb[82].mxu1  ;;  %4768 = vmatmul.mubr.msk.f32.gmra.mrb[72].mxu0 %vm40_vm1, %v5030_v6  ;;  %5047 = vtanh.f32 %v1418_v11  ;;  %v5961_v6 = vld [vmem:[#allocation2] sm:$0xff] }
 0x185   :  { %v1108_v10 = vpop.f32.mrb[83].mxu1  ;;  %4770 = vmatprep.mubr.msk.f32.mxu0 %vm40_vm1, %v5032_v7  ;;  %5049 = vtanh.f32 %v1419_v16  ;;  %v1421_v22 = vadd.f32 %v4587_v8, %v5706_v14 }
 0x186   :  { %v1420_v18 = vadd.f32 %v5706_v14, %v1108_v10  ;;  %v5040_v20 = vpop.eup %5039 }
 0x187   :  { %v5042_v25 = vpop.eup %5041 }
 0x188   :  { %v4590_v15 = vpop.f32.mrb[84].mxu1  ;;  %4771 = vmatmul.mubr.msk.f32.gmra.mrb[74].mxu0 %vm40_vm1, %v5034_v12  ;;  %5051 = vtanh.f32 %v1420_v18 }
 0x189   :  { %v1118_v17 = vpop.f32.mrb[85].mxu1  ;;  %4773 = vmatprep.mubr.msk.f32.mxu0 %vm40_vm1, %v5036_v13  ;;  %5053 = vtanh.f32 %v1421_v22  ;;  %v1423_v28 = vadd.f32 %v4590_v15, %v5706_v14 }
 0x18a   :  { %v1422_v24 = vadd.f32 %v5706_v14, %v1118_v17  ;;  %v5044_v26 = vpop.eup %5043 }
 0x18b   :  { %v5046_v31 = vpop.eup %5045 }
 0x18c   :  { %v4593_v21 = vpop.f32.mrb[86].mxu1  ;;  %4774 = vmatmul.mubr.msk.f32.gmra.mrb[76].mxu0 %vm40_vm1, %v5038_v19  ;;  %5055 = vtanh.f32 %v1422_v24 }
 0x18d   :  { %v1128_v23 = vpop.f32.mrb[87].mxu1  ;;  %4776 = vmatprep.mubr.msk.f32.mxu0 %vm40_vm1, %v5040_v20  ;;  %5057 = vtanh.f32 %v1423_v28  ;;  %v1425_v34 = vadd.f32 %v4593_v21, %v5706_v14 }
 0x18e   :  { %v1424_v30 = vadd.f32 %v5706_v14, %v1128_v23  ;;  %v5048_v32 = vpop.eup %5047 }
 0x18f   :  { %v5050_v37 = vpop.eup %5049 }
 0x190   :  { %v4596_v27 = vpop.f32.mrb[88].mxu1  ;;  %4777 = vmatmul.mubr.msk.f32.gmra.mrb[78].mxu0 %vm40_vm1, %v5042_v25  ;;  %5059 = vtanh.f32 %v1424_v30 }
 0x191   :  { %v1138_v29 = vpop.f32.mrb[89].mxu1  ;;  %4779 = vmatprep.mubr.msk.f32.mxu0 %vm40_vm1, %v5044_v26  ;;  %5061 = vtanh.f32 %v1425_v34  ;;  %v1427_v40 = vadd.f32 %v4596_v27, %v5706_v14 }
 0x192   :  { %v1426_v36 = vadd.f32 %v5706_v14, %v1138_v29  ;;  %v5052_v38 = vpop.eup %5051 }
 0x193   :  { %v5054_v43 = vpop.eup %5053 }
 0x194   :  { %v4599_v33 = vpop.f32.mrb[90].mxu1  ;;  %4780 = vmatmul.mubr.msk.f32.gmra.mrb[80].mxu0 %vm40_vm1, %v5046_v31  ;;  %5063 = vtanh.f32 %v1426_v36 }
 0x195   :  { %v1148_v35 = vpop.f32.mrb[91].mxu1  ;;  %4782 = vmatprep.mubr.msk.f32.mxu0 %vm40_vm1, %v5048_v32  ;;  %5065 = vtanh.f32 %v1427_v40  ;;  %v1429_v46 = vadd.f32 %v4599_v33, %v5706_v14 }
 0x196   :  { %v1428_v42 = vadd.f32 %v5706_v14, %v1148_v35  ;;  %v5056_v44 = vpop.eup %5055 }
 0x197   :  { %v5058_v49 = vpop.eup %5057 }
 0x198   :  { %v4602_v39 = vpop.f32.mrb[92].mxu1  ;;  %4783 = vmatmul.mubr.msk.f32.gmra.mrb[82].mxu0 %vm40_vm1, %v5050_v37  ;;  %5067 = vtanh.f32 %v1428_v42 }
 0x199   :  { %v1158_v41 = vpop.f32.mrb[93].mxu1  ;;  %4785 = vmatprep.mubr.msk.f32.mxu0 %vm40_vm1, %v5052_v38  ;;  %5069 = vtanh.f32 %v1429_v46  ;;  %v1431_v52 = vadd.f32 %v4602_v39, %v5706_v14 }
 0x19a   :  { %v1430_v48 = vadd.f32 %v5706_v14, %v1158_v41  ;;  %v5060_v50 = vpop.eup %5059 }
 0x19b   :  { %v5062_v55 = vpop.eup %5061 }
 0x19c   :  { %v4605_v45 = vpop.f32.mrb[94].mxu1  ;;  %4786 = vmatmul.mubr.msk.f32.gmra.mrb[84].mxu0 %vm40_vm1, %v5054_v43  ;;  %5071 = vtanh.f32 %v1430_v48 }
 0x19d   :  { %v1168_v47 = vpop.f32.mrb[95].mxu1  ;;  %4788 = vmatprep.mubr.msk.f32.mxu0 %vm40_vm1, %v5056_v44  ;;  %5073 = vtanh.f32 %v1431_v52  ;;  %v1433_v58 = vadd.f32 %v4605_v45, %v5706_v14 }
 0x19e   :  { %v1432_v54 = vadd.f32 %v5706_v14, %v1168_v47  ;;  %v5064_v56 = vpop.eup %5063 }
 0x19f   :  { %v5066_v61 = vpop.eup %5065 }
 0x1a0   :  { %v4608_v51 = vpop.f32.mrb[96].mxu1  ;;  %4789 = vmatmul.mubr.msk.f32.gmra.mrb[86].mxu0 %vm40_vm1, %v5058_v49  ;;  %5075 = vtanh.f32 %v1432_v54 }
 0x1a1   :  { %v1178_v53 = vpop.f32.mrb[97].mxu1  ;;  %4791 = vmatprep.mubr.msk.f32.mxu0 %vm40_vm1, %v5060_v50  ;;  %5077 = vtanh.f32 %v1433_v58  ;;  %v1435_v0 = vadd.f32 %v4608_v51, %v5706_v14 }
 0x1a2   :  { %v1434_v60 = vadd.f32 %v5706_v14, %v1178_v53  ;;  %v5068_v62 = vpop.eup %5067 }
 0x1a3   :  { %v5070_v3 = vpop.eup %5069 }
 0x1a4   :  { %v4611_v57 = vpop.f32.mrb[98].mxu1  ;;  %4792 = vmatmul.mubr.msk.f32.gmra.mrb[88].mxu0 %vm40_vm1, %v5062_v55  ;;  %5079 = vtanh.f32 %v1434_v60 }
 0x1a5   :  { %v1188_v59 = vpop.f32.mrb[99].mxu1  ;;  %4794 = vmatprep.mubr.msk.f32.mxu0 %vm40_vm1, %v5064_v56  ;;  %5081 = vtanh.f32 %v1435_v0  ;;  %v1437_v7 = vadd.f32 %v5961_v6, %v4611_v57 }
 0x1a6   :  { %v1436_v2 = vadd.f32 %v5706_v14, %v1188_v59  ;;  %v5072_v4 = vpop.eup %5071 }
 0x1a7   :  { %v5074_v10 = vpop.eup %5073 }
 0x1a8   :  { %v4614_v63 = vpop.f32.mrb[100].mxu1  ;;  %4795 = vmatmul.mubr.msk.f32.gmra.mrb[90].mxu0 %vm40_vm1, %v5066_v61  ;;  %5083 = vtanh.f32 %v1436_v2 }
 0x1a9   :  { %v1198_v1 = vpop.f32.mrb[101].mxu1  ;;  %4797 = vmatprep.mubr.msk.f32.mxu0 %vm40_vm1, %v5068_v62  ;;  %5085 = vtanh.f32 %v1437_v7  ;;  %v1439_v14 = vadd.f32 %v5961_v6, %v4614_v63 }
 0x1aa   :  { %v1438_v9 = vadd.f32 %v5961_v6, %v1198_v1  ;;  %v5076_v11 = vpop.eup %5075 }
 0x1ab   :  { %v5078_v16 = vpop.eup %5077 }
 0x1ac   :  { %v4617_v5 = vpop.f32.mrb[102].mxu1  ;;  %4798 = vmatmul.mubr.msk.f32.gmra.mrb[92].mxu0 %vm40_vm1, %v5070_v3  ;;  %5087 = vtanh.f32 %v1438_v9 }
 0x1ad   :  { %v1208_v8 = vpop.f32.mrb[103].mxu1  ;;  %4800 = vmatprep.mubr.msk.f32.mxu0 %vm40_vm1, %v5072_v4  ;;  %5089 = vtanh.f32 %v1439_v14  ;;  %v1441_v19 = vadd.f32 %v5961_v6, %v4617_v5 }
 0x1ae   :  { %v1440_v15 = vadd.f32 %v5961_v6, %v1208_v8  ;;  %v5080_v17 = vpop.eup %5079 }
 0x1af   :  { %v5082_v22 = vpop.eup %5081 }
 0x1b0   :  { %v4620_v12 = vpop.f32.mrb[104].mxu1  ;;  %4801 = vmatmul.mubr.msk.f32.gmra.mrb[94].mxu0 %vm40_vm1, %v5074_v10  ;;  %5091 = vtanh.f32 %v1440_v15 }
 0x1b1   :  { %v1218_v13 = vpop.f32.mrb[105].mxu1  ;;  %4803 = vmatprep.mubr.msk.f32.mxu0 %vm40_vm1, %v5076_v11  ;;  %5093 = vtanh.f32 %v1441_v19  ;;  %v1443_v25 = vadd.f32 %v5961_v6, %v4620_v12 }
 0x1b2   :  { %v1442_v21 = vadd.f32 %v5961_v6, %v1218_v13  ;;  %v5084_v23 = vpop.eup %5083 }
 0x1b3   :  { %v5086_v28 = vpop.eup %5085 }
 0x1b4   :  { %v4623_v18 = vpop.f32.mrb[106].mxu1  ;;  %4804 = vmatmul.mubr.msk.f32.gmra.mrb[96].mxu0 %vm40_vm1, %v5078_v16  ;;  %5095 = vtanh.f32 %v1442_v21 }
 0x1b5   :  { %v1228_v20 = vpop.f32.mrb[107].mxu1  ;;  %4806 = vmatprep.mubr.msk.f32.mxu0 %vm40_vm1, %v5080_v17  ;;  %5097 = vtanh.f32 %v1443_v25  ;;  %v1445_v31 = vadd.f32 %v5961_v6, %v4623_v18 }
 0x1b6   :  { %v1444_v27 = vadd.f32 %v5961_v6, %v1228_v20  ;;  %v5088_v29 = vpop.eup %5087 }
 0x1b7   :  { %v5090_v34 = vpop.eup %5089 }
 0x1b8   :  { %v4626_v24 = vpop.f32.mrb[108].mxu1  ;;  %4807 = vmatmul.mubr.msk.f32.gmra.mrb[98].mxu0 %vm40_vm1, %v5082_v22  ;;  %5099 = vtanh.f32 %v1444_v27 }
 0x1b9   :  { %v1238_v26 = vpop.f32.mrb[109].mxu1  ;;  %4809 = vmatprep.mubr.msk.f32.mxu0 %vm40_vm1, %v5084_v23  ;;  %5101 = vtanh.f32 %v1445_v31  ;;  %v1447_v37 = vadd.f32 %v5961_v6, %v4626_v24 }
 0x1ba   :  { %v1446_v33 = vadd.f32 %v5961_v6, %v1238_v26  ;;  %v5092_v35 = vpop.eup %5091 }
 0x1bb   :  { %v5094_v40 = vpop.eup %5093 }
 0x1bc   :  { %v4629_v30 = vpop.f32.mrb[110].mxu1  ;;  %4810 = vmatmul.mubr.msk.f32.gmra.mrb[100].mxu0 %vm40_vm1, %v5086_v28  ;;  %5103 = vtanh.f32 %v1446_v33 }
 0x1bd   :  { %v1248_v32 = vpop.f32.mrb[111].mxu1  ;;  %4812 = vmatprep.mubr.msk.f32.mxu0 %vm40_vm1, %v5088_v29  ;;  %5105 = vtanh.f32 %v1447_v37  ;;  %v1449_v43 = vadd.f32 %v5961_v6, %v4629_v30 }
 0x1be   :  { %v1448_v39 = vadd.f32 %v5961_v6, %v1248_v32  ;;  %v5096_v41 = vpop.eup %5095 }
 0x1bf   :  { %v5098_v46 = vpop.eup %5097 }
 0x1c0   :  { %v4632_v36 = vpop.f32.mrb[112].mxu1  ;;  %4813 = vmatmul.mubr.msk.f32.gmra.mrb[102].mxu0 %vm40_vm1, %v5090_v34  ;;  %5107 = vtanh.f32 %v1448_v39 }
 0x1c1   :  { %v1258_v38 = vpop.f32.mrb[113].mxu1  ;;  %4815 = vmatprep.mubr.msk.f32.mxu0 %vm40_vm1, %v5092_v35  ;;  %5109 = vtanh.f32 %v1449_v43  ;;  %v1451_v49 = vadd.f32 %v5961_v6, %v4632_v36 }
 0x1c2   :  { %v1450_v45 = vadd.f32 %v5961_v6, %v1258_v38  ;;  %v5100_v47 = vpop.eup %5099 }
 0x1c3   :  { %v5102_v52 = vpop.eup %5101 }
 0x1c4   :  { %v4635_v42 = vpop.f32.mrb[114].mxu1  ;;  %4816 = vmatmul.mubr.msk.f32.gmra.mrb[104].mxu0 %vm40_vm1, %v5094_v40  ;;  %5111 = vtanh.f32 %v1450_v45 }
 0x1c5   :  { %v1268_v44 = vpop.f32.mrb[115].mxu1  ;;  %4818 = vmatprep.mubr.msk.f32.mxu0 %vm40_vm1, %v5096_v41  ;;  %5113 = vtanh.f32 %v1451_v49  ;;  %v1453_v57 = vadd.f32 %v5961_v6, %v4635_v42 }
 0x1c6   :  { %v1452_v51 = vadd.f32 %v5961_v6, %v1268_v44  ;;  %v5104_v54 = vpop.eup %5103 }
 0x1c7   :  { %v5106_v60 = vpop.eup %5105 }
 0x1c8   :  { %v4638_v48 = vpop.f32.mrb[116].mxu1  ;;  %4819 = vmatmul.mubr.msk.f32.gmra.mrb[106].mxu0 %vm40_vm1, %v5098_v46  ;;  %5115 = vtanh.f32 %v1452_v51 }
 0x1c9   :  { %v1278_v50 = vpop.f32.mrb[117].mxu1  ;;  %4821 = vmatprep.mubr.msk.f32.mxu0 %vm40_vm1, %v5100_v47  ;;  %5117 = vtanh.f32 %v1453_v57  ;;  %v1455_v1 = vadd.f32 %v5961_v6, %v4638_v48 }
 0x1ca   :  { %v1454_v59 = vadd.f32 %v5961_v6, %v1278_v50  ;;  %v5108_v62 = vpop.eup %5107 }
 0x1cb   :  { %v4664_v53 = vpop.f32.mrb[2].mxu0  ;;  %v5110_v4 = vpop.eup %5109 }
 0x1cc   :  { %v4641_v55 = vpop.f32.mrb[118].mxu1  ;;  %4822 = vmatmul.mubr.msk.f32.gmra.mrb[108].mxu0 %vm40_vm1, %v5102_v52  ;;  %2819 = vperm.xlu0 %4885, %v4664_v53   ;;  %v2048_v56 = vpop.f32.mrb[3].mxu0  ;;  %5119 = vtanh.f32 %v1454_v59 }
 0x1cd   :  { %v1288_v58 = vpop.f32.mrb[119].mxu1  ;;  %4824 = vmatprep.mubr.msk.f32.mxu0 %vm40_vm1, %v5104_v54  ;;  %5121 = vtanh.f32 %v1455_v1  ;;  %v1457_v10 = vadd.f32 %v5961_v6, %v4641_v55 }
 0x1ce   :  { %v1456_v3 = vadd.f32 %v5961_v6, %v1288_v58  ;;  %v5112_v7 = vpop.eup %5111 }
 0x1cf   :  { %v4667_v61 = vpop.f32.mrb[4].mxu0  ;;  %v5114_v14 = vpop.eup %5113 }
 0x1d0   :  { %v4644_v63 = vpop.f32.mrb[120].mxu1  ;;  %4825 = vmatmul.mubr.msk.f32.gmra.mrb[110].mxu0 %vm40_vm1, %v5106_v60  ;;  %2816 = vperm.xlu0 %4885, %v2048_v56   ;;  %v2058_v0 = vpop.f32.mrb[5].mxu0  ;;  %5123 = vtanh.f32 %v1456_v3 }
 0x1d1   :  { %2825 = vperm.xlu1 %4886, %v4667_v61   ;;  %v1298_v2 = vpop.f32.mrb[121].mxu1  ;;  %4827 = vmatprep.mubr.msk.f32.mxu0 %vm40_vm1, %v5108_v62  ;;  %5125 = vtanh.f32 %v1457_v10  ;;  %v1459_v18 = vadd.f32 %v5961_v6, %v4644_v63 }
 0x1d2   :  { %v1458_v12 = vadd.f32 %v5961_v6, %v1298_v2  ;;  %v5116_v15 = vpop.eup %5115 }
 0x1d3   :  { %v4670_v5 = vpop.f32.mrb[6].mxu0  ;;  %v5118_v21 = vpop.eup %5117 }
 0x1d4   :  { %v4647_v8 = vpop.f32.mrb[122].mxu1  ;;  %4828 = vmatmul.mubr.msk.f32.gmra.mrb[112].mxu0 %vm40_vm1, %v5110_v4  ;;  %v2068_v9 = vpop.f32.mrb[7].mxu0  ;;  %5127 = vtanh.f32 %v1458_v12 }
 0x1d5   :  { %2822 = vperm.xlu1 %4886, %v2058_v0   ;;  %v1308_v11 = vpop.f32.mrb[123].mxu1  ;;  %4830 = vmatprep.mubr.msk.f32.mxu0 %vm40_vm1, %v5112_v7  ;;  %v1461_v22 = vadd.f32 %v5961_v6, %v4647_v8  ;;  %5129 = vtanh.f32 %v1459_v18 }
 0x1d6   :  { %2828 = vperm.xlu0 %4885, %v2068_v9   ;;  %v1460_v20 = vadd.f32 %v5961_v6, %v1308_v11  ;;  %v5120_v24 = vpop.eup %5119 }
 0x1d7   :  { %v4673_v13 = vpop.f32.mrb[8].mxu0  ;;  %v5122_v31 = vpop.eup %5121 }
 0x1d8   :  { %v4650_v16 = vpop.f32.mrb[124].mxu1  ;;  %4831 = vmatmul.mubr.msk.f32.gmra.mrb[114].mxu0 %vm40_vm1, %v5114_v14  ;;  %v2078_v17 = vpop.f32.mrb[9].mxu0  ;;  %5131 = vtanh.f32 %v1460_v20 }
 0x1d9   :  { %2831 = vperm.xlu1 %4886, %v4670_v5   ;;  %v1318_v19 = vpop.f32.mrb[125].mxu1  ;;  %4833 = vmatprep.mubr.msk.f32.mxu0 %vm40_vm1, %v5116_v15  ;;  %5133 = vtanh.f32 %v1461_v22  ;;  %v1463_v35 = vadd.f32 %v5961_v6, %v4650_v16 }
 0x1da   :  { %2834 = vperm.xlu0 %4885, %v2078_v17   ;;  %v1462_v29 = vadd.f32 %v5961_v6, %v1318_v19  ;;  %v5124_v33 = vpop.eup %5123 }
 0x1db   :  { %v4676_v23 = vpop.f32.mrb[10].mxu0  ;;  %v5126_v36 = vpop.eup %5125 }
 0x1dc   :  { %v4653_v25 = vpop.f32.mrb[126].mxu1  ;;  %4834 = vmatmul.mubr.msk.f32.gmra.mrb[116].mxu0 %vm40_vm1, %v5118_v21  ;;  %v2088_v26 = vpop.f32.mrb[11].mxu0 }
 0x1dd   :  { %v1465_v27 = vadd.f32 %v5961_v6, %v4653_v25  ;;  %2837 = vperm.xlu1 %4886, %v4673_v13   ;;  %v1328_v28 = vpop.f32.mrb[127].mxu1  ;;  %4836 = vmatprep.mubr.msk.f32.mxu0 %vm40_vm1, %v5120_v24 }
 0x1de   :  { %v1464_v30 = vadd.f32 %v5961_v6, %v1328_v28  ;;  %2840 = vperm.xlu0 %4885, %v2088_v26   ;;  %v5128_v38 = vpop.eup %5127 }
 0x1df   :  { %v4679_v32 = vpop.f32.mrb[12].mxu0  ;;  %v5130_v40 = vpop.eup %5129 }
 0x1e0   :  { %5135 = vtanh.f32 %v1464_v30  ;;  %4837 = vmatmul.mubr.msk.f32.gmra.mrb[118].mxu0 %vm40_vm1, %v5122_v31  ;;  %v2098_v34 = vpop.f32.mrb[13].mxu0 }
 0x1e1   :  { %5137 = vtanh.f32 %v1465_v27  ;;  %2843 = vperm.xlu1 %4886, %v4676_v23   ;;  %4839 = vmatprep.mubr.msk.f32.mxu0 %vm40_vm1, %v5124_v33 }
 0x1e2   :  { %5139 = vtanh.f32 %v1462_v29  ;;  %2846 = vperm.xlu0 %4885, %v2098_v34   ;;  %v5132_v6 = vpop.eup %5131 }
 0x1e3   :  { %v4682_v37 = vpop.f32.mrb[14].mxu0  ;;  %5141 = vtanh.f32 %v1463_v35  ;;  %v5134_v43 = vpop.eup %5133 }
 0x1e4   :  { %4840 = vmatmul.mubr.msk.f32.gmra.mrb[120].mxu0 %vm40_vm1, %v5126_v36  ;;  %v2108_v39 = vpop.f32.mrb[15].mxu0 }
 0x1e5   :  { %2849 = vperm.xlu1 %4886, %v4679_v32   ;;  %4842 = vmatprep.mubr.msk.f32.mxu0 %vm40_vm1, %v5128_v38 }
 0x1e6   :  { %2852 = vperm.xlu0 %4885, %v2108_v39  }
 0x1e7   :  { %v4685_v41 = vpop.f32.mrb[16].mxu0 }
 0x1e8   :  { %4843 = vmatmul.mubr.msk.f32.gmra.mrb[122].mxu0 %vm40_vm1, %v5130_v40  ;;  %v2118_v42 = vpop.f32.mrb[17].mxu0 }
 0x1e9   :  { %2855 = vperm.xlu1 %4886, %v4682_v37   ;;  %4845 = vmatprep.mubr.msk.f32.mxu0 %vm40_vm1, %v5132_v6 }
 0x1ea   :  { %v5136_v44 = vpop.eup %5135  ;;  %2858 = vperm.xlu0 %4885, %v2118_v42  }
 0x1eb   :  { %v5138_v45 = vpop.eup %5137  ;;  %v4688_v46 = vpop.f32.mrb[18].mxu0  ;;  %4851 = vmatprep.mubr.msk.f32.mxu1 %vm40_vm1, %v5136_v44 }
 0x1ec   :  { %v5140_v47 = vpop.eup %5139  ;;  %4846 = vmatmul.mubr.msk.f32.gmra.mrb[124].mxu0 %vm40_vm1, %v5134_v43  ;;  %4852 = vmatmul.mubr.msk.f32.vlgmr.msra.gmra.mrb[128].mxu1 %vm40_vm1, %v5138_v45  ;;  %v2128_v48 = vpop.f32.mrb[19].mxu0 }
 0x1ed   :  { %2861 = vperm.xlu1 %4886, %v4685_v41   ;;  %4848 = vmatprep.mubr.msk.f32.mxu0 %vm40_vm1, %v5140_v47  ;;  %v5142_v49 = vpop.eup %5141 }
 0x1ee   :  { %2864 = vperm.xlu0 %4885, %v2128_v48  }
 0x1ef   :  { %v4691_v50 = vpop.f32.mrb[20].mxu0 }
 0x1f0   :  { %4849 = vmatmul.mubr.msk.f32.gmra.mrb[126].mxu0 %vm40_vm1, %v5142_v49  ;;  %v2138_v51 = vpop.f32.mrb[21].mxu0 }
 0x1f1   :  { %2867 = vperm.xlu1 %4886, %v4688_v46  }
 0x1f2   :  { %2870 = vperm.xlu0 %4885, %v2138_v51  }
 0x1f3   :  { %v4694_v52 = vpop.f32.mrb[22].mxu0 }
 0x1f4   :  { %v2148_v53 = vpop.f32.mrb[23].mxu0 }
 0x1f5   :  { %2873 = vperm.xlu1 %4886, %v4691_v50  }
 0x1f6   :  { %2876 = vperm.xlu0 %4885, %v2148_v53  }
 0x1f7   :  { %v4697_v54 = vpop.f32.mrb[24].mxu0 }
 0x1f8   :  { %v2158_v55 = vpop.f32.mrb[25].mxu0 }
 0x1f9   :  { %2879 = vperm.xlu1 %4886, %v4694_v52  }
 0x1fa   :  { %2882 = vperm.xlu0 %4885, %v2158_v55  }
 0x1fb   :  { %v4700_v56 = vpop.f32.mrb[26].mxu0 }
 0x1fc   :  { %v2168_v57 = vpop.f32.mrb[27].mxu0 }
 0x1fd   :  { %2885 = vperm.xlu1 %4886, %v4697_v54  }
 0x1fe   :  { %2888 = vperm.xlu0 %4885, %v2168_v57  }
 0x1ff   :  { %v4703_v58 = vpop.f32.mrb[28].mxu0 }
 0x200   :  { %v2178_v59 = vpop.f32.mrb[29].mxu0 }
 0x201   :  { %2891 = vperm.xlu1 %4886, %v4700_v56  }
 0x202   :  { %2894 = vperm.xlu0 %4885, %v2178_v59  }
 0x203   :  { %v4706_v60 = vpop.f32.mrb[30].mxu0 }
 0x204   :  { %v2188_v61 = vpop.f32.mrb[31].mxu0 }
 0x205   :  { %2897 = vperm.xlu1 %4886, %v4703_v58  }
 0x206   :  { %2900 = vperm.xlu0 %4885, %v2188_v61  }
 0x207   :  { %v4709_v62 = vpop.f32.mrb[32].mxu0 }
 0x208   :  { %v2198_v63 = vpop.f32.mrb[33].mxu0 }
 0x209   :  { %2903 = vperm.xlu1 %4886, %v4706_v60  }
 0x20a   :  { %2906 = vperm.xlu0 %4885, %v2198_v63  }
 0x20b   :  { %v4712_v0 = vpop.f32.mrb[34].mxu0 }
 0x20c   :  { %v2208_v1 = vpop.f32.mrb[35].mxu0 }
 0x20d   :  { %2909 = vperm.xlu1 %4886, %v4709_v62  }
 0x20e   :  { %2912 = vperm.xlu0 %4885, %v2208_v1  }
 0x20f   :  { %v4715_v2 = vpop.f32.mrb[36].mxu0 }
 0x210   :  { %v2218_v3 = vpop.f32.mrb[37].mxu0 }
 0x211   :  { %2915 = vperm.xlu1 %4886, %v4712_v0  }
 0x212   :  { %2918 = vperm.xlu0 %4885, %v2218_v3  }
 0x213   :  { %v4718_v4 = vpop.f32.mrb[38].mxu0 }
 0x214   :  { %v2228_v5 = vpop.f32.mrb[39].mxu0 }
 0x215   :  { %2921 = vperm.xlu1 %4886, %v4715_v2  }
 0x216   :  { %2924 = vperm.xlu0 %4885, %v2228_v5  }
 0x217   :  { %v4721_v7 = vpop.f32.mrb[40].mxu0 }
 0x218   :  { %v2238_v8 = vpop.f32.mrb[41].mxu0 }
 0x219   :  { %2927 = vperm.xlu1 %4886, %v4718_v4  }
 0x21a   :  { %2930 = vperm.xlu0 %4885, %v2238_v8  }
 0x21b   :  { %v4724_v9 = vpop.f32.mrb[42].mxu0 }
 0x21c   :  { %v2248_v10 = vpop.f32.mrb[43].mxu0 }
 0x21d   :  { %2933 = vperm.xlu1 %4886, %v4721_v7  }
 0x21e   :  { %2936 = vperm.xlu0 %4885, %v2248_v10  }
 0x21f   :  { %v4727_v11 = vpop.f32.mrb[44].mxu0 }
 0x220   :  { %v2258_v12 = vpop.f32.mrb[45].mxu0 }
 0x221   :  { %2939 = vperm.xlu1 %4886, %v4724_v9  }
 0x222   :  { %2942 = vperm.xlu0 %4885, %v2258_v12  }
 0x223   :  { %v4730_v14 = vpop.f32.mrb[46].mxu0 }
 0x224   :  { %v2268_v13 = vpop.f32.mrb[47].mxu0 }
 0x225   :  { %2945 = vperm.xlu1 %4886, %v4727_v11  }
 0x226   :  { %2948 = vperm.xlu0 %4885, %v2268_v13  }
 0x227   :  { %v4733_v15 = vpop.f32.mrb[48].mxu0 }
 0x228   :  { %v2278_v16 = vpop.f32.mrb[49].mxu0 }
 0x229   :  { %2951 = vperm.xlu1 %4886, %v4730_v14  }
 0x22a   :  { %2954 = vperm.xlu0 %4885, %v2278_v16  }
 0x22b   :  { %v4736_v17 = vpop.f32.mrb[50].mxu0 }
 0x22c   :  { %v2288_v18 = vpop.f32.mrb[51].mxu0 }
 0x22d   :  { %2957 = vperm.xlu1 %4886, %v4733_v15  }
 0x22e   :  { %2960 = vperm.xlu0 %4885, %v2288_v18  }
 0x22f   :  { %v4739_v19 = vpop.f32.mrb[52].mxu0 }
 0x230   :  { %v2298_v20 = vpop.f32.mrb[53].mxu0 }
 0x231   :  { %2963 = vperm.xlu1 %4886, %v4736_v17  }
 0x232   :  { %2966 = vperm.xlu0 %4885, %v2298_v20  }
 0x233   :  { %v4742_v21 = vpop.f32.mrb[54].mxu0 }
 0x234   :  { %v2308_v22 = vpop.f32.mrb[55].mxu0 }
 0x235   :  { %2969 = vperm.xlu1 %4886, %v4739_v19  }
 0x236   :  { %2972 = vperm.xlu0 %4885, %v2308_v22  }
 0x237   :  { %v4745_v23 = vpop.f32.mrb[56].mxu0 }
 0x238   :  { %v2318_v24 = vpop.f32.mrb[57].mxu0 }
 0x239   :  { %2975 = vperm.xlu1 %4886, %v4742_v21  }
 0x23a   :  { %2978 = vperm.xlu0 %4885, %v2318_v24  }
 0x23b   :  { %v4748_v25 = vpop.f32.mrb[58].mxu0 }
 0x23c   :  { %v2328_v26 = vpop.f32.mrb[59].mxu0 }
 0x23d   :  { %2981 = vperm.xlu1 %4886, %v4745_v23  }
 0x23e   :  { %2984 = vperm.xlu0 %4885, %v2328_v26  }
 0x23f   :  { %v4751_v27 = vpop.f32.mrb[60].mxu0 }
 0x240   :  { %v2338_v28 = vpop.f32.mrb[61].mxu0 }
 0x241   :  { %2987 = vperm.xlu1 %4886, %v4748_v25  }
 0x242   :  { %2990 = vperm.xlu0 %4885, %v2338_v28   ;;  %v3199_v28 = vlaneseq }
 0x243   :  { %v4754_v29 = vpop.f32.mrb[62].mxu0 }
 0x244   :  { %v2348_v30 = vpop.f32.mrb[63].mxu0 }
 0x245   :  { %2993 = vperm.xlu1 %4886, %v4751_v27  }
 0x246   :  { %2996 = vperm.xlu0 %4885, %v2348_v30  }
 0x247   :  { %v4757_v31 = vpop.f32.mrb[64].mxu0 }
 0x248   :  { %v2358_v32 = vpop.f32.mrb[65].mxu0 }
 0x249   :  { %2999 = vperm.xlu1 %4886, %v4754_v29  }
 0x24a   :  { %3002 = vperm.xlu0 %4885, %v2358_v32  }
 0x24b   :  { %v6028_v33 = vpop.permute.xlu0 %2819  ;;  %v4760_v34 = vpop.f32.mrb[66].mxu0 }
 0x24c   :  { %v2368_v35 = vpop.f32.mrb[67].mxu0 }
 0x24d   :  { %3005 = vperm.xlu1 %4886, %v4757_v31  }
 0x24e   :  { %3008 = vperm.xlu0 %4885, %v2368_v35   ;;  %v3202_v35 = vshrl.u32 %v3199_v28, 7 }
 0x24f   :  { %v6030_v36 = vpop.permute.xlu0 %2816  ;;  %v4763_v37 = vpop.f32.mrb[68].mxu0 }
 0x250   :  { %v6032_v38 = vpop.permute.xlu1 %2825  ;;  %v2378_v39 = vpop.f32.mrb[69].mxu0 }
 0x251   :  { %3011 = vperm.xlu1 %4886, %v4760_v34   ;;  %v6090_v34 = vand.u32 127, %v3199_v28 }
 0x252   :  { %3014 = vperm.xlu0 %4885, %v2378_v39  }
 0x253   :  { %v4766_v40 = vpop.f32.mrb[70].mxu0  ;;  %vm3889_vm9 = vcmp.lt.s32.totalorder %v6090_v34, 8 }
 0x254   :  { %v6034_v41 = vpop.permute.xlu1 %2822  ;;  %v2388_v6 = vpop.f32.mrb[71].mxu0 }
 0x255   :  { %v6036_v42 = vpop.permute.xlu0 %2828  ;;  %3017 = vperm.xlu1 %4886, %v4763_v37  }
 0x256   :  { %3020 = vperm.xlu0 %4885, %v2388_v6  }
 0x257   :  { %v4769_v43 = vpop.f32.mrb[72].mxu0 }
 0x258   :  { %v6038_v44 = vpop.permute.xlu1 %2831  ;;  %v2398_v45 = vpop.f32.mrb[73].mxu0 }
 0x259   :  { %v6040_v46 = vpop.permute.xlu0 %2834  ;;  %3023 = vperm.xlu1 %4886, %v4766_v40  }
 0x25a   :  { %3026 = vperm.xlu0 %4885, %v2398_v45  }
 0x25b   :  { %v4772_v47 = vpop.f32.mrb[74].mxu0 }
 0x25c   :  { %v6042_v48 = vpop.permute.xlu1 %2837  ;;  %v2408_v49 = vpop.f32.mrb[75].mxu0 }
 0x25d   :  { %v6044_v50 = vpop.permute.xlu0 %2840  ;;  %3029 = vperm.xlu1 %4886, %v4769_v43   ;;  %v6095_v43 = vsub.s32 %v6090_v34, %v3202_v35 }
 0x25e   :  { %3032 = vperm.xlu0 %4885, %v2408_v49  }
 0x25f   :  { %v4775_v51 = vpop.f32.mrb[76].mxu0 }
 0x260   :  { %v6046_v52 = vpop.permute.xlu1 %2843  ;;  %v2418_v53 = vpop.f32.mrb[77].mxu0 }
 0x261   :  { %v6048_v54 = vpop.permute.xlu0 %2846  ;;  %3035 = vperm.xlu1 %4886, %v4772_v47  }
 0x262   :  { %3038 = vperm.xlu0 %4885, %v2418_v53  }
 0x263   :  { %v4778_v55 = vpop.f32.mrb[78].mxu0 }
 0x264   :  { %v6050_v56 = vpop.permute.xlu1 %2849  ;;  %v2428_v57 = vpop.f32.mrb[79].mxu0 }
 0x265   :  { %v6052_v58 = vpop.permute.xlu0 %2852  ;;  %3041 = vperm.xlu1 %4886, %v4775_v51  }
 0x266   :  { %3047 = vperm.xlu0 %4885, %v4778_v55  }
 0x267   :  { %v4781_v59 = vpop.f32.mrb[80].mxu0 }
 0x268   :  { %v6054_v60 = vpop.permute.xlu1 %2855  ;;  %v2438_v61 = vpop.f32.mrb[81].mxu0 }
 0x269   :  { %v6056_v62 = vpop.permute.xlu0 %2858  ;;  %3044 = vperm.xlu1 %4886, %v2428_v57  }
 0x26a   :  { %3050 = vperm.xlu0 %4885, %v2438_v61  }
 0x26b   :  { %v4784_v63 = vpop.f32.mrb[82].mxu0 }
 0x26c   :  { %v6058_v0 = vpop.permute.xlu1 %2861  ;;  %v2448_v1 = vpop.f32.mrb[83].mxu0 }
 0x26d   :  { %v6060_v2 = vpop.permute.xlu0 %2864  ;;  %3053 = vperm.xlu1 %4886, %v4781_v59  }
 0x26e   :  { %3056 = vperm.xlu0 %4885, %v2448_v1  }
 0x26f   :  { %v4787_v3 = vpop.f32.mrb[84].mxu0 }
 0x270   :  { %v6062_v4 = vpop.permute.xlu1 %2867  ;;  %v2458_v5 = vpop.f32.mrb[85].mxu0 }
 0x271   :  { %v6064_v7 = vpop.permute.xlu0 %2870  ;;  %3059 = vperm.xlu1 %4886, %v4784_v63  }
 0x272   :  { %3062 = vperm.xlu0 %4885, %v2458_v5  }
 0x273   :  { %v4790_v8 = vpop.f32.mrb[86].mxu0 }
 0x274   :  { %v6066_v9 = vpop.permute.xlu1 %2873  ;;  %v2468_v10 = vpop.f32.mrb[87].mxu0 }
 0x275   :  { %v6068_v11 = vpop.permute.xlu0 %2876  ;;  %3065 = vperm.xlu1 %4886, %v4787_v3  }
 0x276   :  { %3071 = vperm.xlu0 %4885, %v4790_v8  }
 0x277   :  { %v4793_v12 = vpop.f32.mrb[88].mxu0 }
 0x278   :  { %v6070_v14 = vpop.permute.xlu1 %2879  ;;  %v2478_v13 = vpop.f32.mrb[89].mxu0 }
 0x279   :  { %v6072_v15 = vpop.permute.xlu0 %2882  ;;  %3068 = vperm.xlu1 %4886, %v2468_v10  }
 0x27a   :  { %3074 = vperm.xlu0 %4885, %v2478_v13  }
 0x27b   :  { %v4796_v16 = vpop.f32.mrb[90].mxu0 }
 0x27c   :  { %v6074_v17 = vpop.permute.xlu1 %2885  ;;  %v2488_v18 = vpop.f32.mrb[91].mxu0 }
 0x27d   :  { %v6076_v19 = vpop.permute.xlu0 %2888  ;;  %3077 = vperm.xlu1 %4886, %v4793_v12  }
 0x27e   :  { %3080 = vperm.xlu0 %4885, %v2488_v18  }
 0x27f   :  { %v4799_v20 = vpop.f32.mrb[92].mxu0 }
 0x280   :  { %v6078_v21 = vpop.permute.xlu1 %2891  ;;  %v2498_v22 = vpop.f32.mrb[93].mxu0 }
 0x281   :  { %v6080_v23 = vpop.permute.xlu0 %2894  ;;  %3083 = vperm.xlu1 %4886, %v4796_v16  }
 0x282   :  { %3086 = vperm.xlu0 %4885, %v2498_v22  }
 0x283   :  { %v4802_v24 = vpop.f32.mrb[94].mxu0 }
 0x284   :  { %v6082_v25 = vpop.permute.xlu1 %2897  ;;  %v2508_v26 = vpop.f32.mrb[95].mxu0 }
 0x285   :  { %v6084_v27 = vpop.permute.xlu0 %2900  ;;  %3089 = vperm.xlu1 %4886, %v4799_v20  }
 0x286   :  { %3095 = vperm.xlu0 %4885, %v4802_v24  }
 0x287   :  { %v4805_v29 = vpop.f32.mrb[96].mxu0 }
 0x288   :  { %v6086_v30 = vpop.permute.xlu1 %2903  ;;  %v2518_v31 = vpop.f32.mrb[97].mxu0 }
 0x289   :  { %v6088_v32 = vpop.permute.xlu0 %2906  ;;  %3092 = vperm.xlu1 %4886, %v2508_v26  }
 0x28a   :  { %3098 = vperm.xlu0 %4885, %v2518_v31  }
 0x28b   :  { %v4808_v37 = vpop.f32.mrb[98].mxu0 }
 0x28c   :  { %v6092_v39 = vpop.permute.xlu1 %2909  ;;  %v2528_v40 = vpop.f32.mrb[99].mxu0 }
 0x28d   :  { %v2913_v6 = vpop.permute.xlu0 %2912  ;;  %3101 = vperm.xlu1 %4886, %v4805_v29  }
 0x28e   :  { %3104 = vperm.xlu0 %4885, %v2528_v40   ;;  %v3332_v51 = vrot.slane %v2913_v6, %v6095_v43 }
 0x28f   :  { %v4811_v45 = vpop.f32.mrb[100].mxu0 }
 0x290   :  { %v2916_v47 = vpop.permute.xlu1 %2915  ;;  %v2538_v49 = vpop.f32.mrb[101].mxu0 }
 0x291   :  { %v3336_v53 = vrot.slane %v2916_v47, %v6095_v43  ;;  %v2919_v55 = vpop.permute.xlu0 %2918  ;;  %3107 = vperm.xlu1 %4886, %v4808_v37  }
 0x292   :  { %v3340_v57 = vrot.slane %v2919_v55, %v6095_v43  ;;  %3110 = vperm.xlu0 %4885, %v2538_v49  }
 0x293   :  { %v3748_v59 = vsel %vm3713_vm2, %v3336_v53, %v3332_v51  ;;  %v4814_v61 = vpop.f32.mrb[102].mxu0 }
 0x294   :  { %v3749_v63 = vsel %vm3715_vm3, %v3340_v57, %v3748_v59  ;;  %v2922_v1 = vpop.permute.xlu1 %2921  ;;  %v2548_v3 = vpop.f32.mrb[103].mxu0 }
 0x295   :  { %v3344_v5 = vrot.slane %v2922_v1, %v6095_v43  ;;  %v2925_v8 = vpop.permute.xlu0 %2924  ;;  %3113 = vperm.xlu1 %4886, %v4811_v45  }
 0x296   :  { %v3348_v10 = vrot.slane %v2925_v8, %v6095_v43  ;;  %3119 = vperm.xlu0 %4885, %v4814_v61  }
 0x297   :  { %v3750_v12 = vsel %vm3717_vm4, %v3344_v5, %v3749_v63  ;;  %v4817_v13 = vpop.f32.mrb[104].mxu0 }
 0x298   :  { %v3751_v16 = vsel %vm3719_vm5, %v3348_v10, %v3750_v12  ;;  %v2928_v18 = vpop.permute.xlu1 %2927  ;;  %v2558_v20 = vpop.f32.mrb[105].mxu0 }
 0x299   :  { %v3352_v22 = vrot.slane %v2928_v18, %v6095_v43  ;;  %v2931_v24 = vpop.permute.xlu0 %2930  ;;  %3116 = vperm.xlu1 %4886, %v2548_v3  }
 0x29a   :  { %v3356_v26 = vrot.slane %v2931_v24, %v6095_v43  ;;  %3122 = vperm.xlu0 %4885, %v2558_v20  }
 0x29b   :  { %v3752_v28 = vsel %vm3721_vm6, %v3352_v22, %v3751_v16  ;;  %v4820_v29 = vpop.f32.mrb[106].mxu0 }
 0x29c   :  { %v3753_v31 = vsel %vm3723_vm7, %v3356_v26, %v3752_v28  ;;  %v2934_v35 = vpop.permute.xlu1 %2933  ;;  %v2568_v37 = vpop.f32.mrb[107].mxu0 }
 0x29d   :  { %v3360_v40 = vrot.slane %v2934_v35, %v6095_v43  ;;  %v2937_v6 = vpop.permute.xlu0 %2936  ;;  %3125 = vperm.xlu1 %4886, %v4817_v13  }
 0x29e   :  { %3128 = vperm.xlu0 %4885, %v2568_v37   ;;  %v3364_v53 = vrot.slane %v2937_v6, %v6095_v43 }
 0x29f   :  { %v4823_v45 = vpop.f32.mrb[108].mxu0  ;;  %v6112_v47 = vsel %vm3725_vm8, %v3360_v40, %v3753_v31 }
 0x2a0   :  { %v2940_v49 = vpop.permute.xlu1 %2939  ;;  %v2578_v51 = vpop.f32.mrb[109].mxu0 }
 0x2a1   :  { %v3368_v55 = vrot.slane %v2940_v49, %v6095_v43  ;;  %v2943_v57 = vpop.permute.xlu0 %2942  ;;  %3131 = vperm.xlu1 %4886, %v4820_v29  }
 0x2a2   :  { %v3372_v59 = vrot.slane %v2943_v57, %v6095_v43  ;;  %3134 = vperm.xlu0 %4885, %v2578_v51  }
 0x2a3   :  { %v3755_v61 = vsel %vm3713_vm2, %v3368_v55, %v3364_v53  ;;  %v4826_v63 = vpop.f32.mrb[110].mxu0 }
 0x2a4   :  { %v3756_v1 = vsel %vm3715_vm3, %v3372_v59, %v3755_v61  ;;  %v2946_v3 = vpop.permute.xlu1 %2945  ;;  %v2588_v5 = vpop.f32.mrb[111].mxu0 }
 0x2a5   :  { %v3376_v8 = vrot.slane %v2946_v3, %v6095_v43  ;;  %v2949_v10 = vpop.permute.xlu0 %2948  ;;  %3137 = vperm.xlu1 %4886, %v4823_v45  }
 0x2a6   :  { %v3380_v12 = vrot.slane %v2949_v10, %v6095_v43  ;;  %3143 = vperm.xlu0 %4885, %v4826_v63  }
 0x2a7   :  { %v3757_v13 = vsel %vm3717_vm4, %v3376_v8, %v3756_v1  ;;  %v4829_v16 = vpop.f32.mrb[112].mxu0 }
 0x2a8   :  { %v3758_v18 = vsel %vm3719_vm5, %v3380_v12, %v3757_v13  ;;  %v2952_v20 = vpop.permute.xlu1 %2951  ;;  %v2598_v22 = vpop.f32.mrb[113].mxu0 }
 0x2a9   :  { %v3384_v24 = vrot.slane %v2952_v20, %v6095_v43  ;;  %v2955_v26 = vpop.permute.xlu0 %2954  ;;  %3140 = vperm.xlu1 %4886, %v2588_v5  }
 0x2aa   :  { %v3388_v28 = vrot.slane %v2955_v26, %v6095_v43  ;;  %3146 = vperm.xlu0 %4885, %v2598_v22  }
 0x2ab   :  { %v3759_v29 = vsel %vm3721_vm6, %v3384_v24, %v3758_v18  ;;  %v4832_v31 = vpop.f32.mrb[114].mxu0 }
 0x2ac   :  { %v3760_v35 = vsel %vm3723_vm7, %v3388_v28, %v3759_v29  ;;  %v2958_v37 = vpop.permute.xlu1 %2957  ;;  %v2608_v40 = vpop.f32.mrb[115].mxu0 }
 0x2ad   :  { %v3392_v6 = vrot.slane %v2958_v37, %v6095_v43  ;;  %v2961_v45 = vpop.permute.xlu0 %2960  ;;  %3149 = vperm.xlu1 %4886, %v4829_v16  }
 0x2ae   :  { %3152 = vperm.xlu0 %4885, %v2608_v40   ;;  %v3396_v57 = vrot.slane %v2961_v45, %v6095_v43 }
 0x2af   :  { %v4835_v49 = vpop.f32.mrb[116].mxu0  ;;  %v6129_v51 = vsel %vm3725_vm8, %v3392_v6, %v3760_v35 }
 0x2b0   :  { %v2964_v53 = vpop.permute.xlu1 %2963  ;;  %v2618_v55 = vpop.f32.mrb[117].mxu0 }
 0x2b1   :  { %v3400_v59 = vrot.slane %v2964_v53, %v6095_v43  ;;  %v2967_v61 = vpop.permute.xlu0 %2966  ;;  %3155 = vperm.xlu1 %4886, %v4832_v31  }
 0x2b2   :  { %v3404_v63 = vrot.slane %v2967_v61, %v6095_v43  ;;  %3158 = vperm.xlu0 %4885, %v2618_v55  }
 0x2b3   :  { %v3762_v1 = vsel %vm3713_vm2, %v3400_v59, %v3396_v57  ;;  %v4838_v3 = vpop.f32.mrb[118].mxu0 }
 0x2b4   :  { %v3763_v5 = vsel %vm3715_vm3, %v3404_v63, %v3762_v1  ;;  %v2970_v8 = vpop.permute.xlu1 %2969  ;;  %v2628_v10 = vpop.f32.mrb[119].mxu0 }
 0x2b5   :  { %v3408_v12 = vrot.slane %v2970_v8, %v6095_v43  ;;  %v2973_v13 = vpop.permute.xlu0 %2972  ;;  %3161 = vperm.xlu1 %4886, %v4835_v49  }
 0x2b6   :  { %v3412_v16 = vrot.slane %v2973_v13, %v6095_v43  ;;  %3167 = vperm.xlu0 %4885, %v4838_v3  }
 0x2b7   :  { %v3764_v18 = vsel %vm3717_vm4, %v3408_v12, %v3763_v5  ;;  %v4841_v20 = vpop.f32.mrb[120].mxu0 }
 0x2b8   :  { %v3765_v22 = vsel %vm3719_vm5, %v3412_v16, %v3764_v18  ;;  %v2976_v24 = vpop.permute.xlu1 %2975  ;;  %v2638_v26 = vpop.f32.mrb[121].mxu0 }
 0x2b9   :  { %v3416_v28 = vrot.slane %v2976_v24, %v6095_v43  ;;  %v2979_v29 = vpop.permute.xlu0 %2978  ;;  %3164 = vperm.xlu1 %4886, %v2628_v10  }
 0x2ba   :  { %v3420_v31 = vrot.slane %v2979_v29, %v6095_v43  ;;  %3173 = vperm.xlu0 %4885, %v4841_v20   ;;  %v3212_v29 = vrot.slane %v6034_v41, %v6095_v43  ;;  %v3220_v41 = vrot.slane %v6036_v42, %v6095_v43 }
 0x2bb   :  { %v3766_v35 = vsel %vm3721_vm6, %v3416_v28, %v3765_v22  ;;  %v4844_v37 = vpop.f32.mrb[122].mxu0 }
 0x2bc   :  { %v3767_v40 = vsel %vm3723_vm7, %v3420_v31, %v3766_v35  ;;  %v2982_v6 = vpop.permute.xlu1 %2981  ;;  %v2648_v45 = vpop.f32.mrb[123].mxu0  ;;  %v3208_v35 = vrot.slane %v6028_v33, %v6095_v43  ;;  %v3236_v33 = vrot.slane %v6044_v50, %v6095_v43  ;;  %v3272_v50 = vrot.slane %v6062_v4, %v6095_v43 }
 0x2bd   :  { %v3424_v49 = vrot.slane %v2982_v6, %v6095_v43  ;;  %v6145_v53 = vpop.permute.xlu0 %2984  ;;  %3179 = vperm.xlu1 %4886, %v4844_v37  }
 0x2be   :  { %3170 = vperm.xlu0 %4885, %v2638_v26   ;;  %v3204_v26 = vrot.slane %v6030_v36, %v6095_v43 }
 0x2bf   :  { %v4853_v55 = vpop.f32.mrb[128].mxu1  ;;  %v4847_v57 = vpop.f32.mrb[124].mxu0  ;;  %v6148_v59 = vsel %vm3725_vm8, %v3424_v49, %v3767_v40  ;;  %v3216_v49 = vrot.slane %v6032_v38, %v6095_v43  ;;  %v3224_v38 = vrot.slane %v6038_v44, %v6095_v43  ;;  %v3256_v44 = vrot.slane %v6054_v60, %v6095_v43 }
 0x2c0   :  { %v6150_v61 = vpop.permute.xlu1 %2987  ;;  %v2678_v63 = vpop.f32.mrb[129].mxu1  ;;  %v3714_v37 = vsel %vm3713_vm2, %v3208_v35, %v3204_v26  ;;  %v3268_v35 = vrot.slane %v6060_v2, %v6095_v43  ;;  %v3304_v60 = vrot.slane %v6078_v21, %v6095_v43 }
 0x2c1   :  { %v6152_v1 = vpop.permute.xlu0 %2990  ;;  %3185 = vperm.xlu1 %4886, %v4847_v57   ;;  %v2658_v3 = vpop.f32.mrb[125].mxu0  ;;  %v3716_v6 = vsel %vm3715_vm3, %v3212_v29, %v3714_v37  ;;  %v3244_v57 = vrot.slane %v6048_v54, %v6095_v43  ;;  %v3252_v54 = vrot.slane %v6052_v58, %v6095_v43  ;;  %v3232_v58 = vrot.slane %v6042_v48, %v6095_v43 }
 0x2c2   :  { %3176 = vperm.xlu0 %4885, %v2648_v45   ;;  %v3240_v45 = vrot.slane %v6046_v52, %v6095_v43 }
 0x2c3   :  { %v4850_v5 = vpop.f32.mrb[126].mxu0 }
 0x2c4   :  { %v6154_v8 = vpop.permute.xlu1 %2993  ;;  %v2668_v10 = vpop.f32.mrb[127].mxu0  ;;  %v3727_v52 = vsel %vm3713_vm2, %v3240_v45, %v3236_v33  ;;  %v3280_v45 = vrot.slane %v6066_v9, %v6095_v43  ;;  %v3300_v33 = vrot.slane %v6076_v19, %v6095_v43 }
 0x2c5   :  { %v6156_v12 = vpop.permute.xlu0 %2996  ;;  %3191 = vperm.xlu1 %4886, %v4850_v5  }
 0x2c6   :  { %3182 = vperm.xlu0 %4885, %v2658_v3   ;;  %v3248_v3 = vrot.slane %v6050_v56, %v6095_v43  ;;  %v3228_v56 = vrot.slane %v6040_v46, %v6095_v43  ;;  %v3734_v46 = vsel %vm3713_vm2, %v3272_v50, %v3268_v35  ;;  %v3741_v19 = vsel %vm3713_vm2, %v3304_v60, %v3300_v33 }
 0x2c7   :  { %v3320_v35 = vrot.slane %v6086_v30, %v6095_v43  ;;  %v3432_v30 = vrot.slane %v6150_v61, %v6095_v43  ;;  %v3440_v33 = vrot.slane %v6154_v8, %v6095_v43 }
 0x2c8   :  { %v6158_v13 = vpop.permute.xlu1 %2999 }
 0x2c9   :  { %v6160_v16 = vpop.permute.xlu0 %3002  ;;  %3188 = vperm.xlu1 %4886, %v2668_v10   ;;  %v3728_v10 = vsel %vm3715_vm3, %v3244_v57, %v3727_v52  ;;  %v3284_v57 = vrot.slane %v6068_v11, %v6095_v43  ;;  %v3448_v8 = vrot.slane %v6158_v13, %v6095_v43 }
 0x2ca   :  { %3194 = vperm.xlu0 %4885, %v2678_v63   ;;  %v3729_v29 = vsel %vm3717_vm4, %v3248_v3, %v3728_v10 }
 0x2cb   :  { %v3730_v2 = vsel %vm3719_vm5, %v3252_v54, %v3729_v29  ;;  %v3292_v54 = vrot.slane %v6072_v15, %v6095_v43  ;;  %v3296_v29 = vrot.slane %v6074_v17, %v6095_v43  ;;  %v3328_v17 = vrot.slane %v6092_v39, %v6095_v43 }
 0x2cc   :  { %v6162_v18 = vpop.permute.xlu1 %3005  ;;  %v3731_v48 = vsel %vm3721_vm6, %v3256_v44, %v3730_v2 }
 0x2cd   :  { %v6164_v20 = vpop.permute.xlu0 %3008  ;;  %3197 = vperm.xlu1 %4886, %v4853_v55   ;;  %v3718_v55 = vsel %vm3717_vm4, %v3216_v49, %v3716_v6  ;;  %v3276_v6 = vrot.slane %v6064_v7, %v6095_v43  ;;  %v3260_v49 = vrot.slane %v6056_v62, %v6095_v43  ;;  %v3264_v7 = vrot.slane %v6058_v0, %v6095_v43 }
 0x2ce   :  { %v3720_v42 = vsel %vm3719_vm5, %v3220_v41, %v3718_v55  ;;  %v3308_v62 = vrot.slane %v6080_v23, %v6095_v43  ;;  %v3288_v0 = vrot.slane %v6070_v14, %v6095_v43 }
 0x2cf   :  { %v3722_v4 = vsel %vm3721_vm6, %v3224_v38, %v3720_v42  ;;  %v3735_v21 = vsel %vm3715_vm3, %v3276_v6, %v3734_v46  ;;  %v3312_v38 = vrot.slane %v6082_v25, %v6095_v43  ;;  %v3732_v11 = vsel %vm3723_vm7, %v3260_v49, %v3731_v48 }
 0x2d0   :  { %v6166_v22 = vpop.permute.xlu1 %3011  ;;  %v3724_v9 = vsel %vm3723_vm7, %v3228_v56, %v3722_v4  ;;  %v3736_v3 = vsel %vm3717_vm4, %v3280_v45, %v3735_v21  ;;  %v3733_v23 = vsel %vm3725_vm8, %v3264_v7, %v3732_v11  ;;  %v3742_v14 = vsel %vm3715_vm3, %v3308_v62, %v3741_v19 }
 0x2d1   :  { %v6168_v24 = vpop.permute.xlu0 %3014  ;;  %v3726_v52 = vsel %vm3725_vm8, %v3232_v58, %v3724_v9  ;;  %v3737_v10 = vsel %vm3719_vm5, %v3284_v57, %v3736_v3  ;;  %v3316_v56 = vrot.slane %v6084_v27, %v6095_v43  ;;  %v3743_v44 = vsel %vm3717_vm4, %v3312_v38, %v3742_v14 }
 0x2d2   :  { %v3738_v25 = vsel %vm3721_vm6, %v3288_v0, %v3737_v10  ;;  %v3324_v6 = vrot.slane %v6088_v32, %v6095_v43  ;;  %v3428_v49 = vrot.slane %v6145_v53, %v6095_v43  ;;  %v3436_v48 = vrot.slane %v6152_v1, %v6095_v43 }
 0x2d3   :  { %v3744_v15 = vsel %vm3719_vm5, %v3316_v56, %v3743_v44  ;;  %v3739_v27 = vsel %vm3723_vm7, %v3292_v54, %v3738_v25  ;;  %v3464_v61 = vrot.slane %v6166_v22, %v6095_v43  ;;  %v3444_v57 = vrot.slane %v6156_v12, %v6095_v43 }
 0x2d4   :  { %v6172_v28 = vpop.permute.xlu1 %3017  ;;  %v3745_v46 = vsel %vm3721_vm6, %v3320_v35, %v3744_v15  ;;  %v3740_v45 = vsel %vm3725_vm8, %v3296_v29, %v3739_v27  ;;  %v3769_v39 = vsel %vm3713_vm2, %v3432_v30, %v3428_v49  ;;  %v3460_v1 = vrot.slane %v6164_v20, %v6095_v43 }
 0x2d5   :  { %v6176_v31 = vpop.permute.xlu0 %3020  ;;  %v3746_v32 = vsel %vm3723_vm7, %v3324_v6, %v3745_v46  ;;  %v3770_v53 = vsel %vm3715_vm3, %v3436_v48, %v3769_v39  ;;  %v3472_v20 = vrot.slane %v6172_v28, %v6095_v43  ;;  %v3456_v14 = vrot.slane %v6162_v18, %v6095_v43 }
 0x2d6   :  { %v3747_v7 = vsel %vm3725_vm8, %v3328_v17, %v3746_v32  ;;  %v3771_v62 = vsel %vm3717_vm4, %v3440_v33, %v3770_v53  ;;  %v3776_v22 = vsel %vm3713_vm2, %v3464_v61, %v3460_v1  ;;  %v3476_v28 = vrot.slane %v6176_v31, %v6095_v43 }
 0x2d7   :  { %v3772_v19 = vsel %vm3719_vm5, %v3444_v57, %v3771_v62 }
 0x2d8   :  { %v6181_v40 = vpop.permute.xlu1 %3023 }
 0x2d9   :  { %v6186_v36 = vpop.permute.xlu0 %3026 }
 0x2dc   :  { %v6197_v63 = vpop.permute.xlu1 %3029 }
 0x2dd   :  { %v6202_v5 = vpop.permute.xlu0 %3032  ;;  %v3488_v46 = vrot.slane %v6197_v63, %v6095_v43 }
 0x2de   :  { %v3492_v13 = vrot.slane %v6202_v5, %v6095_v43 }
 0x2e0   :  { %v6212_v26 = vpop.permute.xlu1 %3035 }
 0x2e1   :  { %v6221_v37 = vpop.permute.xlu0 %3038  ;;  %v3496_v0 = vrot.slane %v6212_v26, %v6095_v43 }
 0x2e2   :  { %v3500_v26 = vrot.slane %v6221_v37, %v6095_v43 }
 0x2e4   :  { %v6236_v41 = vpop.permute.xlu1 %3041 }
 0x2e5   :  { %v6243_v55 = vpop.permute.xlu0 %3047  ;;  %v3504_v5 = vrot.slane %v6236_v41, %v6095_v43 }
 0x2e6   :  { %v3512_v17 = vrot.slane %v6243_v55, %v6095_v43 }
 0x2e8   :  { %v6258_v42 = vpop.permute.xlu1 %3044  ;;  %3848 = vxpose.xlu0.b32.start [1/16] (narrow) %v3726_v52, 8  ;;  %v3468_v52 = vrot.slane %v6168_v24, %v6095_v43  ;;  %v3773_v24 = vsel %vm3721_vm6, %v3448_v8, %v3772_v19 }
 0x2e9   :  { %v6261_v50 = vpop.permute.xlu0 %3050  ;;  %v3508_v37 = vrot.slane %v6258_v42, %v6095_v43 }
 0x2ea   :  { %v3777_v38 = vsel %vm3715_vm3, %v3468_v52, %v3776_v22  ;;  %v3516_v30 = vrot.slane %v6261_v50, %v6095_v43 }
 0x2eb   :  { %v3778_v54 = vsel %vm3717_vm4, %v3472_v20, %v3777_v38 }
 0x2ec   :  { %v6276_v4 = vpop.permute.xlu1 %3053  ;;  %3849 = vxpose.xlu0.b32.cont [2/16] (narrow) %v3733_v23, 8  ;;  %v3783_v23 = vsel %vm3713_vm2, %v3496_v0, %v3492_v13  ;;  %v3779_v44 = vsel %vm3719_vm5, %v3476_v28, %v3778_v54 }
 0x2ed   :  { %v3057_v58 = vpop.permute.xlu0 %3056  ;;  %v3784_v41 = vsel %vm3715_vm3, %v3500_v26, %v3783_v23  ;;  %v3520_v33 = vrot.slane %v6276_v4, %v6095_v43 }
 0x2ee   :  { %v3524_v31 = vrot.slane %v3057_v58, %v6095_v43  ;;  %v3785_v42 = vsel %vm3717_vm4, %v3504_v5, %v3784_v41  ;;  %v3484_v58 = vrot.slane %v6186_v36, %v6095_v43 }
 0x2ef   :  { %v3786_v15 = vsel %vm3719_vm5, %v3508_v37, %v3785_v42 }
 0x2f0   :  { %v3060_v60 = vpop.permute.xlu1 %3059  ;;  %3850 = vxpose.xlu0.b32.cont [3/16] (narrow) %v3740_v45, 8  ;;  %v3787_v49 = vsel %vm3721_vm6, %v3512_v17, %v3786_v15 }
 0x2f1   :  { %v3063_v2 = vpop.permute.xlu0 %3062  ;;  %v3528_v10 = vrot.slane %v3060_v60, %v6095_v43  ;;  %v3788_v53 = vsel %vm3723_vm7, %v3516_v30, %v3787_v49 }
 0x2f2   :  { %v3532_v25 = vrot.slane %v3063_v2, %v6095_v43 }
 0x2f3   :  { %v3790_v18 = vsel %vm3713_vm2, %v3528_v10, %v3524_v31 }
 0x2f4   :  { %v3066_v9 = vpop.permute.xlu1 %3065  ;;  %3851 = vxpose.xlu0.b32.cont [4/16] (narrow) %v3747_v7, 8  ;;  %v3791_v36 = vsel %vm3715_vm3, %v3532_v25, %v3790_v18 }
 0x2f5   :  { %v6299_v21 = vpop.permute.xlu0 %3071  ;;  %v3536_v35 = vrot.slane %v3066_v9, %v6095_v43 }
 0x2f6   :  { %v3544_v9 = vrot.slane %v6299_v21, %v6095_v43 }
 0x2f7   :  { %v3792_v32 = vsel %vm3717_vm4, %v3536_v35, %v3791_v36 }
 0x2f8   :  { %v3069_v3 = vpop.permute.xlu1 %3068  ;;  %3852 = vxpose.xlu0.b32.cont [5/16] (narrow) %v6112_v47, 8  ;;  %v3452_v47 = vrot.slane %v6160_v16, %v6095_v43 }
 0x2f9   :  { %v6315_v12 = vpop.permute.xlu0 %3074  ;;  %v3540_v6 = vrot.slane %v3069_v3, %v6095_v43 }
 0x2fa   :  { %v3774_v56 = vsel %vm3723_vm7, %v3452_v47, %v3773_v24  ;;  %v3548_v57 = vrot.slane %v6315_v12, %v6095_v43  ;;  %v3789_v12 = vsel %vm3725_vm8, %v3520_v33, %v3788_v53 }
 0x2fb   :  { %v3775_v45 = vsel %vm3725_vm8, %v3456_v14, %v3774_v56  ;;  %v3793_v7 = vsel %vm3719_vm5, %v3540_v6, %v3792_v32 }
 0x2fc   :  { %v6328_v11 = vpop.permute.xlu1 %3077  ;;  %3853 = vxpose.xlu0.b32.cont [6/16] (narrow) %v6129_v51, 8  ;;  %v3480_v51 = vrot.slane %v6181_v40, %v6095_v43  ;;  %v3794_v62 = vsel %vm3721_vm6, %v3544_v9, %v3793_v7 }
 0x2fd   :  { %v3081_v16 = vpop.permute.xlu0 %3080  ;;  %v3552_v21 = vrot.slane %v6328_v11, %v6095_v43  ;;  %v3795_v20 = vsel %vm3723_vm7, %v3548_v57, %v3794_v62 }
 0x2fe   :  { %v3556_v60 = vrot.slane %v3081_v16, %v6095_v43 }
 0x2ff   :  { %v3796_v26 = vsel %vm3725_vm8, %v3552_v21, %v3795_v20 }
 0x300   :  { %v3084_v29 = vpop.permute.xlu1 %3083  ;;  %3854 = vxpose.xlu0.b32.cont [7/16] (narrow) %v6148_v59, 8  ;;  %v3780_v59 = vsel %vm3721_vm6, %v3480_v51, %v3779_v44 }
 0x301   :  { %v3087_v40 = vpop.permute.xlu0 %3086  ;;  %v3560_v27 = vrot.slane %v3084_v29, %v6095_v43  ;;  %v3781_v55 = vsel %vm3723_vm7, %v3484_v58, %v3780_v59 }
 0x302   :  { %v3564_v63 = vrot.slane %v3087_v40, %v6095_v43  ;;  %v3782_v61 = vsel %vm3725_vm8, %v3488_v46, %v3781_v55 }
 0x303   :  { %v3797_v39 = vsel %vm3713_vm2, %v3560_v27, %v3556_v60 }
 0x304   :  { %v3090_v2 = vpop.permute.xlu1 %3089  ;;  %3855 = vxpose.xlu0.b32.cont [8/16] (narrow) %v3775_v45, 8  ;;  %v3798_v8 = vsel %vm3715_vm3, %v3564_v63, %v3797_v39 }
 0x305   :  { %v3096_v48 = vpop.permute.xlu0 %3095  ;;  %v3568_v50 = vrot.slane %v3090_v2, %v6095_v43 }
 0x306   :  { %v3576_v22 = vrot.slane %v3096_v48, %v6095_v43 }
 0x307   :  { %v3799_v4 = vsel %vm3717_vm4, %v3568_v50, %v3798_v8 }
 0x308   :  { %v3093_v1 = vpop.permute.xlu1 %3092  ;;  %3856 = vxpose.xlu0.b32.cont [9/16] (narrow) %v3782_v61, 8 }
 0x309   :  { %v3572_v52 = vrot.slane %v3093_v1, %v6095_v43  ;;  %v3099_v3 = vpop.permute.xlu0 %3098 }
 0x30a   :  { %v3580_v19 = vrot.slane %v3099_v3, %v6095_v43 }
 0x30b   :  { %v3800_v0 = vsel %vm3719_vm5, %v3572_v52, %v3799_v4 }
 0x30c   :  { %v3102_v13 = vpop.permute.xlu1 %3101  ;;  %3857 = vxpose.xlu0.b32.cont [10/16] (narrow) %v3789_v12, 8  ;;  %v3801_v24 = vsel %vm3721_vm6, %v3576_v22, %v3800_v0 }
 0x30d   :  { %v3105_v47 = vpop.permute.xlu0 %3104  ;;  %v3584_v38 = vrot.slane %v3102_v13, %v6095_v43  ;;  %v3802_v11 = vsel %vm3723_vm7, %v3580_v19, %v3801_v24 }
 0x30e   :  { %v3588_v16 = vrot.slane %v3105_v47, %v6095_v43 }
 0x30f   :  { %v3803_v10 = vsel %vm3725_vm8, %v3584_v38, %v3802_v11 }
 0x310   :  { %v3108_v28 = vpop.permute.xlu1 %3107  ;;  %3858 = vxpose.xlu0.b32.cont [11/16] (narrow) %v3796_v26, 8 }
 0x311   :  { %v3111_v23 = vpop.permute.xlu0 %3110  ;;  %v3592_v5 = vrot.slane %v3108_v28, %v6095_v43 }
 0x312   :  { %v3596_v37 = vrot.slane %v3111_v23, %v6095_v43 }
 0x313   :  { %v3804_v51 = vsel %vm3713_vm2, %v3592_v5, %v3588_v16 }
 0x314   :  { %v3114_v54 = vpop.permute.xlu1 %3113  ;;  %3859 = vxpose.xlu0.b32.cont [12/16] (narrow) %v3803_v10, 8  ;;  %v3805_v41 = vsel %vm3715_vm3, %v3596_v37, %v3804_v51 }
 0x315   :  { %v3120_v14 = vpop.permute.xlu0 %3119  ;;  %v3600_v31 = vrot.slane %v3114_v54, %v6095_v43 }
 0x316   :  { %v3608_v42 = vrot.slane %v3120_v14, %v6095_v43 }
 0x317   :  { %v3806_v44 = vsel %vm3717_vm4, %v3600_v31, %v3805_v41 }
 0x318   :  { %v3117_v56 = vpop.permute.xlu1 %3116 }
 0x319   :  { %v3604_v25 = vrot.slane %v3117_v56, %v6095_v43  ;;  %v3123_v29 = vpop.permute.xlu0 %3122 }
 0x31a   :  { %v3612_v18 = vrot.slane %v3123_v29, %v6095_v43 }
 0x31b   :  { %v3807_v35 = vsel %vm3719_vm5, %v3604_v25, %v3806_v44 }
 0x31c   :  { %v3808_v40 = vsel %vm3721_vm6, %v3608_v42, %v3807_v35  ;;  %v3126_v58 = vpop.permute.xlu1 %3125 }
 0x31d   :  { %v3809_v15 = vsel %vm3723_vm7, %v3612_v18, %v3808_v40  ;;  %v3616_v6 = vrot.slane %v3126_v58, %v6095_v43  ;;  %v3129_v27 = vpop.permute.xlu0 %3128 }
 0x31e   :  { %v3620_v30 = vrot.slane %v3129_v27, %v6095_v43 }
 0x31f   :  { %v3810_v59 = vsel %vm3725_vm8, %v3616_v6, %v3809_v15 }
 0x320   :  { %v3132_v46 = vpop.permute.xlu1 %3131  ;;  %3860 = vxpose.xlu0.b32.cont [13/16] (narrow) %v3810_v59, 8 }
 0x321   :  { %v3135_v17 = vpop.permute.xlu0 %3134  ;;  %v3624_v45 = vrot.slane %v3132_v46, %v6095_v43 }
 0x322   :  { %v3628_v60 = vrot.slane %v3135_v17, %v6095_v43 }
 0x323   :  { %v3811_v49 = vsel %vm3713_vm2, %v3624_v45, %v3620_v30 }
 0x324   :  { %v3138_v36 = vpop.permute.xlu1 %3137  ;;  %v3812_v48 = vsel %vm3715_vm3, %v3628_v60, %v3811_v49 }
 0x325   :  { %v3144_v2 = vpop.permute.xlu0 %3143  ;;  %v3632_v32 = vrot.slane %v3138_v36, %v6095_v43 }
 0x326   :  { %v3640_v50 = vrot.slane %v3144_v2, %v6095_v43 }
 0x327   :  { %v3813_v39 = vsel %vm3717_vm4, %v3632_v32, %v3812_v48 }
 0x328   :  { %v3141_v63 = vpop.permute.xlu1 %3140 }
 0x329   :  { %v3636_v55 = vrot.slane %v3141_v63, %v6095_v43  ;;  %v3147_v7 = vpop.permute.xlu0 %3146 }
 0x32a   :  { %v3644_v33 = vrot.slane %v3147_v7, %v6095_v43 }
 0x32b   :  { %v3814_v9 = vsel %vm3719_vm5, %v3636_v55, %v3813_v39 }
 0x32c   :  { %v3815_v61 = vsel %vm3721_vm6, %v3640_v50, %v3814_v9  ;;  %v3150_v53 = vpop.permute.xlu1 %3149 }
 0x32d   :  { %v3816_v57 = vsel %vm3723_vm7, %v3644_v33, %v3815_v61  ;;  %v3648_v1 = vrot.slane %v3150_v53, %v6095_v43  ;;  %v3153_v62 = vpop.permute.xlu0 %3152 }
 0x32e   :  { %v3652_v22 = vrot.slane %v3153_v62, %v6095_v43 }
 0x32f   :  { %v3817_v8 = vsel %vm3725_vm8, %v3648_v1, %v3816_v57 }
 0x330   :  { %v3156_v52 = vpop.permute.xlu1 %3155  ;;  %3861 = vxpose.xlu0.b32.cont [14/16] (narrow) %v3817_v8, 8 }
 0x331   :  { %v3159_v3 = vpop.permute.xlu0 %3158  ;;  %v3656_v4 = vrot.slane %v3156_v52, %v6095_v43 }
 0x332   :  { %v3660_v12 = vrot.slane %v3159_v3, %v6095_v43 }
 0x333   :  { %v3818_v20 = vsel %vm3713_vm2, %v3656_v4, %v3652_v22 }
 0x334   :  { %v3162_v21 = vpop.permute.xlu1 %3161  ;;  %v3819_v38 = vsel %vm3715_vm3, %v3660_v12, %v3818_v20 }
 0x335   :  { %v3168_v0 = vpop.permute.xlu0 %3167  ;;  %v3664_v19 = vrot.slane %v3162_v21, %v6095_v43 }
 0x336   :  { %v3672_v23 = vrot.slane %v3168_v0, %v6095_v43 }
 0x337   :  { %v3820_v26 = vsel %vm3717_vm4, %v3664_v19, %v3819_v38 }
 0x338   :  { %v3165_v13 = vpop.permute.xlu1 %3164 }
 0x339   :  { %v3668_v24 = vrot.slane %v3165_v13, %v6095_v43  ;;  %v3174_v47 = vpop.permute.xlu0 %3173 }
 0x33a   :  { %v3680_v16 = vrot.slane %v3174_v47, %v6095_v43 }
 0x33b   :  { %v3821_v11 = vsel %vm3719_vm5, %v3668_v24, %v3820_v26 }
 0x33c   :  { %v3180_v28 = vpop.permute.xlu1 %3179  ;;  %v3822_v54 = vsel %vm3721_vm6, %v3672_v23, %v3821_v11 }
 0x33d   :  { %v3171_v5 = vpop.permute.xlu0 %3170  ;;  %v3688_v25 = vrot.slane %v3180_v28, %v6095_v43 }
 0x33e   :  { %v3676_v10 = vrot.slane %v3171_v5, %v6095_v43 }
 0x340   :  { %v3823_v37 = vsel %vm3723_vm7, %v3676_v10, %v3822_v54  ;;  %v3186_v14 = vpop.permute.xlu1 %3185 }
 0x341   :  { %v3177_v51 = vpop.permute.xlu0 %3176  ;;  %v3824_v31 = vsel %vm3725_vm8, %v3680_v16, %v3823_v37  ;;  %v3696_v42 = vrot.slane %v3186_v14, %v6095_v43 }
 0x342   :  { %3862 = vxpose.xlu0.b32.cont [15/16] (narrow) %v3824_v31, 8  ;;  %v3684_v56 = vrot.slane %v3177_v51, %v6095_v43 }
 0x344   :  { %v3192_v41 = vpop.permute.xlu1 %3191  ;;  %v3825_v18 = vsel %vm3713_vm2, %v3688_v25, %v3684_v56 }
 0x345   :  { %v3183_v29 = vpop.permute.xlu0 %3182  ;;  %v3704_v27 = vrot.slane %v3192_v41, %v6095_v43 }
 0x346   :  { %v3692_v44 = vrot.slane %v3183_v29, %v6095_v43 }
 0x348   :  { %v3826_v35 = vsel %vm3715_vm3, %v3692_v44, %v3825_v18  ;;  %v3189_v40 = vpop.permute.xlu1 %3188 }
 0x349   :  { %v3827_v58 = vsel %vm3717_vm4, %v3696_v42, %v3826_v35  ;;  %v3700_v15 = vrot.slane %v3189_v40, %v6095_v43  ;;  %v3195_v6 = vpop.permute.xlu0 %3194 }
 0x34a   :  { %v3708_v59 = vrot.slane %v3195_v6, %v6095_v43 }
 0x34b   :  { %v3828_v46 = vsel %vm3719_vm5, %v3700_v15, %v3827_v58 }
 0x34c   :  { %v3829_v17 = vsel %vm3721_vm6, %v3704_v27, %v3828_v46  ;;  %v3198_v45 = vpop.permute.xlu1 %3197 }
 0x34d   :  { %v3830_v30 = vsel %vm3723_vm7, %v3708_v59, %v3829_v17  ;;  %v3712_v36 = vrot.slane %v3198_v45, %v6095_v43 }
 0x34f   :  { %v3831_v60 = vsel %vm3725_vm8, %v3712_v36, %v3830_v30 }
 0x350   :  { %3863 = vxpose.xlu0.b32.end [16/16] (narrow) %v3831_v60, 8 }
 0x394   :  { %v3864_v2 = vpop.trf.xlu0 }
 0x395   :  { %v3890_v49 = vsel %vm3889_vm9, %v3864_v2, -inf }
 0x396   :  { %3891 = vmax.xlane.f32.xlu1 %v3890_v49 }
 0x423   :  { %v3892_v32 = vpop.xlane.xlu1 %3891 }
 0x424   :  { %v3893_v63 = vsub.f32 %v3890_v49, %v3892_v32 }
 0x426   :  { %v3894_v48 = vmul.f32 1.442695, %v3893_v63 }
 0x428   :  { %5143 = vpow2.f32 %v3894_v48 }
 0x432   :  { %v5144_v55 = vpop.eup %5143 }
 0x433   :  { %3896 = vadd.xlane.f32.xlu1 %v5144_v55 }
 0x4c0   :  { %v3897_v7 = vpop.xlane.xlu1 %3896 }
 0x4c1   :  { %5145 = vrcp.f32 %v3897_v7 }
 0x4cb   :  { %v5146_v39 = vpop.eup %5145 }
 0x4cc   :  { %v3899_v43 = vmul.f32 %v5146_v39, %v5144_v55 }
 0x4ce   :  { %3900 = vst [vmem:[#allocation3] sm:$0xff] %v3899_v43 }
 0x4cf   :  { %5159 = shalt.err (!%p5156_p4)
}
 0x4d0   :  { %s5160_s7 = scalar_lea.hbm %s6478_s6, 128 }
 0x4d1   :  { %p5161_p5 = scmp.ne.s32.totalorder %s6478_s6, %s5160_s7  ;;  %p5164_p6 = scmp.lt.u32.totalorder %s5160_s7, %s6478_s6 }
 0x4d3   :  { %p5166_p7 = pnand %p5164_p6, %p5161_p5 }
 0x4d5   :  { %5169 = shalt.err (!%p5166_p7)
}
 0x4d6   :  { %3910 = dma.vmem_to_hbm [thread:$0]  %s3908_s27, 128, %s6478_s6, [#allocation4]  }
 0x4d7   :  { %5170 = dma.done.wait [#allocation4], 128  }
 0x4d8   :  { %5171 = vsyncadd [#allocation4], 4294967168 }
 0x4d9   :  { %3914 = vsyncpa [#allocation4], 1 }

</bundles_post_ra>
